<compile_context>
chip_gen: v7x
topology: tpu7x:2x2x1
jax: 0.10.0
libtpu: 0.0.40
codegen_flags: <defaults>
</compile_context>

<pallas_src>
import functools

import jax
import jax.numpy as jnp
import numpy as np
from jax.experimental import pallas as pl
from jax.experimental.pallas import tpu as pltpu


def decoder_kernel(emb_ref, enc_ref, hc_ref, mask_ref,
                   wk_ref, wq_ref, we_ref, wb_ref, winv_ref, wemb_ref,
                   wph_ref, bias_ref, out_ref, *, T, H):
    """One grid step == one block of BB batch rows; all T decode steps batched."""
    f32 = jnp.float32
    bf16 = jnp.bfloat16
    S, BB, _ = enc_ref.shape          # (S, BB, 2H) source-major encoder block
    E = emb_ref.shape[-1]

    # ---- bridge: [h0 | c0] = tanh([enc_h | enc_c] @ blockdiag(Wbh, Wbc) + b) ----
    hc = hc_ref[...]                                                    # (BB,4H) bf16
    hc0 = jnp.tanh(jnp.dot(hc, wb_ref[...], preferred_element_type=f32)
                   + bias_ref[:, :2 * H])                               # (BB,2H) f32
    h0 = hc0[:, :H]                                                     # (BB,H)
    c0 = hc0[:, H:2 * H]                                                # (BB,H)

    # ---- Bahdanau attention (step-invariant; computed once per block) ----
    enc3 = enc_ref[...]                                                 # (S,BB,2H) bf16
    enc2 = enc3.reshape(S * BB, 2 * H)                                  # source-major rows
    proj_key = jnp.dot(enc2, wk_ref[...], preferred_element_type=f32)   # (S*BB,H)
    q = jnp.dot(h0.astype(bf16), wq_ref[...], preferred_element_type=f32)  # (BB,H)
    q_rep = jnp.broadcast_to(q[None], (S, BB, H)).reshape(S * BB, H)
    energy = jnp.tanh(proj_key + q_rep)                                 # (S*BB,H)
    # energy_layer as VPU multiply + lane reduce (no N=1 MXU matmul)
    scores = jnp.sum(energy * we_ref[...], axis=-1, keepdims=True)      # (S*BB,1)
    scores = scores.reshape(S, BB, 1)
    scores = jnp.where(mask_ref[...] > 0.0, scores, -1e30)
    m = jnp.max(scores, axis=0, keepdims=True)                          # (1,BB,1)
    p = jnp.exp(scores - m)
    alphas = p / jnp.sum(p, axis=0, keepdims=True)                      # (S,BB,1)
    context = jnp.sum(alphas * enc3.astype(f32), axis=0)                # (BB,2H)

    # ---- fused step-invariant term: [context | h0] @ [[Wih_c, Wp_c],[Whh, 0]] ----
    wi = winv_ref[...]                                                  # (3H,5H) bf16
    inv = (jnp.dot(context.astype(bf16), wi[:2 * H, :], preferred_element_type=f32)
           + jnp.dot(h0.astype(bf16), wi[2 * H:, :], preferred_element_type=f32))  # (BB,5H)
    ginv = inv[:, :4 * H] + bias_ref[:, 2 * H:6 * H]                    # gates part + (b_ih+b_hh)
    pre_ctx = inv[:, 4 * H:]                                            # (BB,H) pre-output part

    def rep_t(x):  # (BB, X) -> (T*BB, X), step-major rows (row t*BB + b = x[b])
        return jnp.broadcast_to(x[None], (T,) + x.shape).reshape(T * BB, x.shape[-1])

    # ---- per-(step, batch) work in 2-D step-major layout ----
    emb2 = emb_ref[...].reshape(T * BB, E)                              # (T*BB,E) bf16
    ve = jnp.dot(emb2, wemb_ref[...], preferred_element_type=f32)       # (T*BB,5H) = [gates|pre]
    gates = ve[:, :4 * H] + rep_t(ginv)                                 # (T*BB,4H)
    i_g = jax.nn.sigmoid(gates[:, 0 * H:1 * H])                         # PyTorch gate order i,f,g,o
    f_g = jax.nn.sigmoid(gates[:, 1 * H:2 * H])
    g_g = jnp.tanh(gates[:, 2 * H:3 * H])
    o_g = jax.nn.sigmoid(gates[:, 3 * H:4 * H])
    c_new = f_g * rep_t(c0) + i_g * g_g
    h_new = o_g * jnp.tanh(c_new)                                       # (T*BB,H)

    pre = (ve[:, 4 * H:]
           + jnp.dot(h_new.astype(bf16), wph_ref[...], preferred_element_type=f32)
           + rep_t(pre_ctx))                                            # (T*BB,H) f32

    # ---- lane-dense store into the (BB, T*H) output block ----
    out3 = pre.reshape(T, BB, H)
    for t in range(T):                                                  # static unroll
        out_ref[:, t * H:(t + 1) * H] = out3[t]


def pack_params(params):
    """Host-side weight fusion + bf16 casts (layout plumbing, not compute)."""
    H = params["wq"].shape[0]
    f32, bf16 = jnp.float32, jnp.bfloat16
    z_hh = jnp.zeros((H, H), f32)
    z_2hh = jnp.zeros((2 * H, H), f32)
    # bridge as one block-diagonal matmul over [enc_h | enc_c]
    wb = jnp.concatenate(
        [jnp.concatenate([params["wbh"], z_2hh], axis=1),
         jnp.concatenate([z_2hh, params["wbc"]], axis=1)], axis=0)      # (4H,2H)
    # step-invariant fused weight for [context | h0] -> [gates | pre_output_ctx]
    w_inv = jnp.concatenate(
        [jnp.concatenate([params["wih_c"], params["wp_c"]], axis=1),
         jnp.concatenate([params["whh"], z_hh], axis=1)], axis=0)       # (3H,5H)
    # embed-side fused weight for embed -> [gates | pre_output_embed]
    w_emb = jnp.concatenate([params["wih_e"], params["wp_e"]], axis=1)  # (E,5H)
    bias = jnp.concatenate([params["bbh"], params["bbc"],
                            params["bih"] + params["bhh"]], axis=1)     # (1,6H)
    return {
        "embedding": params["embedding"].astype(bf16),
        "wk": params["wk"].astype(bf16),
        "wq": params["wq"].astype(bf16),
        "we_row": params["we"].reshape(1, H).astype(f32),   # energy weight as a row (VPU use)
        "wb": wb.astype(bf16),
        "w_inv": w_inv.astype(bf16),
        "w_emb": w_emb.astype(bf16),
        "wp_h": params["wp_h"].astype(bf16),
        "bias": bias.astype(f32),
    }


def decoder_forward(params, tgt_seq, encoder_output, encoder_hidden,
                    encoder_cell, src_mask, *, block_b=8):
    B, T = tgt_seq.shape
    S = encoder_output.shape[1]
    H = params["wq"].shape[0]
    E = params["embedding"].shape[1]
    p = pack_params(params)

    # glue: embedding gather, step/source-major transposes, batch padding
    Bp = ((B + block_b - 1) // block_b) * block_b
    pad = Bp - B
    emb = jnp.transpose(p["embedding"][tgt_seq], (1, 0, 2))              # (T,B,E) bf16
    enc = jnp.transpose(encoder_output, (1, 0, 2)).astype(jnp.bfloat16)  # (S,B,2H)
    hc = jnp.concatenate([encoder_hidden[-1], encoder_cell[-1]],
                         axis=-1).astype(jnp.bfloat16)                   # (B,4H)
    mask = jnp.transpose(src_mask.astype(jnp.float32))[:, :, None]       # (S,B,1)
    if pad:
        emb = jnp.pad(emb, ((0, 0), (0, pad), (0, 0)))
        enc = jnp.pad(enc, ((0, 0), (0, pad), (0, 0)))
        hc = jnp.pad(hc, ((0, pad), (0, 0)))
        mask = jnp.pad(mask, ((0, 0), (0, pad), (0, 0)))
    nb = Bp // block_b

    def const(shape):
        return pl.BlockSpec(shape, lambda b: (0,) * len(shape))

    kernel = functools.partial(decoder_kernel, T=T, H=H)
    out2 = pl.pallas_call(
        kernel,
        out_shape=jax.ShapeDtypeStruct((Bp, T * H), jnp.float32),
        grid_spec=pltpu.PrefetchScalarGridSpec(
            num_scalar_prefetch=0,
            grid=(nb,),
            in_specs=[
                pl.BlockSpec((T, block_b, E), lambda b: (0, b, 0)),      # tgt embeddings
                pl.BlockSpec((S, block_b, 2 * H), lambda b: (0, b, 0)),  # encoder output
                pl.BlockSpec((block_b, 4 * H), lambda b: (b, 0)),        # [enc_h | enc_c]
                pl.BlockSpec((S, block_b, 1), lambda b: (0, b, 0)),      # src mask
                const((2 * H, H)),      # wk
                const((H, H)),          # wq
                const((1, H)),          # we (energy weight row, f32)
                const((4 * H, 2 * H)),  # bridge block-diag
                const((3 * H, 5 * H)),  # fused step-invariant weight
                const((E, 5 * H)),      # fused embed-side weight
                const((H, H)),          # wp_h
                const((1, 6 * H)),      # packed biases (f32)
            ],
            out_specs=pl.BlockSpec((block_b, T * H), lambda b: (b, 0)),
        ),
        compiler_params=pltpu.CompilerParams(
            dimension_semantics=("parallel",),          # shards B-blocks across TCs (v7x)
            vmem_limit_bytes=32 * 1024 * 1024,          # explicit budget, fits v5e/v6e/v7x
        ),
    )(emb, enc, hc, mask,
      p["wk"], p["wq"], p["we_row"], p["wb"], p["w_inv"], p["w_emb"],
      p["wp_h"], p["bias"])

    return out2[:B].reshape(B, T, H)


def decoder_reference(params, tgt_seq, encoder_output, encoder_hidden,
                      encoder_cell, src_mask):
    """Pure-JAX f32 reference mirroring the PyTorch module (for validation)."""
    H = params["wq"].shape[0]
    emb = params["embedding"][tgt_seq]                                  # (B,T,E)
    h0 = jnp.tanh(encoder_hidden[-1] @ params["wbh"] + params["bbh"])   # (B,H)
    c0 = jnp.tanh(encoder_cell[-1] @ params["wbc"] + params["bbc"])     # (B,H)
    proj_key = encoder_output @ params["wk"]                            # (B,S,H)
    q = h0 @ params["wq"]                                               # (B,H)
    energy = jnp.tanh(proj_key + q[:, None, :])                         # (B,S,H)
    scores = jnp.squeeze(energy @ params["we"], -1)                     # (B,S)
    scores = jnp.where(src_mask > 0.0, scores, -1e30)
    alphas = jax.nn.softmax(scores, axis=-1)                            # (B,S)
    context = jnp.einsum("bs,bsh->bh", alphas, encoder_output)          # (B,2H)
    gates = (emb @ params["wih_e"] + (context @ params["wih_c"])[:, None, :]
             + params["bih"] + (h0 @ params["whh"])[:, None, :] + params["bhh"])
    i = jax.nn.sigmoid(gates[..., 0 * H:1 * H])
    f = jax.nn.sigmoid(gates[..., 1 * H:2 * H])
    g = jnp.tanh(gates[..., 2 * H:3 * H])
    o = jax.nn.sigmoid(gates[..., 3 * H:4 * H])
    c = f * c0[:, None, :] + i * g
    h = o * jnp.tanh(c)                                                 # (B,T,H)
    return (emb @ params["wp_e"] + h @ params["wp_h"]
            + (context @ params["wp_c"])[:, None, :])


def init_params(key, vocab, E, H):
    """Deterministic synthetic parameters (shapes match the nn.Module)."""
    ks = jax.random.split(key, 16)
    n = lambda k, shape: (0.1 * jax.random.normal(k, shape)).astype(jnp.float32)
    return {
        "embedding": n(ks[0], (vocab, E)),
        # Bahdanau attention: key(2H->H), query(H->H), energy(H->1), no bias
        "wk": n(ks[1], (2 * H, H)),
        "wq": n(ks[2], (H, H)),
        "we": n(ks[3], (H, 1)),
        # bridges: Linear(2H -> H) with bias
        "wbh": n(ks[4], (2 * H, H)), "bbh": n(ks[5], (1, H)),
        "wbc": n(ks[6], (2 * H, H)), "bbc": n(ks[7], (1, H)),
        # LSTM(E + 2H -> H): W_ih split into embed / context parts, gate order i,f,g,o
        "wih_e": n(ks[8], (E, 4 * H)),
        "wih_c": n(ks[9], (2 * H, 4 * H)),
        "bih": n(ks[10], (1, 4 * H)),
        "whh": n(ks[11], (H, 4 * H)),
        "bhh": n(ks[12], (1, 4 * H)),
        # pre_output_layer: Linear(E + H + 2H -> H, bias=False), split by input chunk
        "wp_e": n(ks[13], (E, H)),
        "wp_h": n(ks[14], (H, H)),
        "wp_c": n(ks[15], (2 * H, H)),
    }


if __name__ == "__main__":
    B, S, T, H, E, VOCAB = 16, 8, 8, 32, 16, 50

    key = jax.random.PRNGKey(0)
    kp, k1, k2, k3, k4 = jax.random.split(key, 5)
    params = init_params(kp, VOCAB, E, H)

    tgt_seq = jax.random.randint(k1, (B, T), 0, VOCAB)
    encoder_output = jax.random.normal(k2, (B, S, 2 * H), jnp.float32)
    encoder_hidden = jax.random.normal(k3, (1, B, 2 * H), jnp.float32)
    encoder_cell = jax.random.normal(k4, (1, B, 2 * H), jnp.float32)
    # mask out the last two source positions to exercise the masked softmax
    src_mask = jnp.ones((B, S), jnp.float32).at[:, S - 2:].set(0.0)

    out = decoder_forward(params, tgt_seq, encoder_output, encoder_hidden,
                          encoder_cell, src_mask)
    out = jax.block_until_ready(out)
    assert out.shape == (B, T, H) and out.dtype == jnp.float32

    ref = decoder_reference(params, tgt_seq, encoder_output, encoder_hidden,
                            encoder_cell, src_mask)
    # tolerance reflects bf16 weight/activation casts inside the kernel
    np.testing.assert_allclose(np.asarray(out), np.asarray(ref),
                               rtol=5e-2, atol=5e-2)
    print("KERNEL_OK")
</pallas_src>

<mosaic_0001>
module attributes {stable_mosaic.version = 11 : i64} {
  func.func @decoder_kernel(%arg0: i32, %arg1: memref<8x8x16xbf16, #tpu.memory_space<vmem>>, %arg2: memref<8x8x64xbf16, #tpu.memory_space<vmem>>, %arg3: memref<8x128xbf16, #tpu.memory_space<vmem>>, %arg4: memref<8x8x1xf32, #tpu.memory_space<vmem>>, %arg5: memref<64x32xbf16, #tpu.memory_space<vmem>>, %arg6: memref<32x32xbf16, #tpu.memory_space<vmem>>, %arg7: memref<1x32xf32, #tpu.memory_space<vmem>>, %arg8: memref<128x64xbf16, #tpu.memory_space<vmem>>, %arg9: memref<96x160xbf16, #tpu.memory_space<vmem>>, %arg10: memref<16x160xbf16, #tpu.memory_space<vmem>>, %arg11: memref<32x32xbf16, #tpu.memory_space<vmem>>, %arg12: memref<1x192xf32, #tpu.memory_space<vmem>>, %arg13: memref<8x256xf32, #tpu.memory_space<vmem>>) attributes {dimension_semantics = [#tpu.dimension_semantics<parallel>], iteration_bounds = array<i64: 2>, scalar_prefetch = 0 : i64, scratch_operands = 0 : i64, tpu.core_type = #tpu.core_type<tc>, window_params = [{transform_indices = @transform_0, window_bounds = array<i64: 8, 8, 16>}, {transform_indices = @transform_1, window_bounds = array<i64: 8, 8, 64>}, {transform_indices = @transform_2, window_bounds = array<i64: 8, 128>}, {transform_indices = @transform_3, window_bounds = array<i64: 8, 8, 1>}, {pipeline_mode = #tpu.pipeline_mode<synchronous>, transform_indices = @transform_4, window_bounds = array<i64: 64, 32>}, {pipeline_mode = #tpu.pipeline_mode<synchronous>, transform_indices = @transform_5, window_bounds = array<i64: 32, 32>}, {pipeline_mode = #tpu.pipeline_mode<synchronous>, transform_indices = @transform_6, window_bounds = array<i64: 1, 32>}, {pipeline_mode = #tpu.pipeline_mode<synchronous>, transform_indices = @transform_7, window_bounds = array<i64: 128, 64>}, {pipeline_mode = #tpu.pipeline_mode<synchronous>, transform_indices = @transform_8, window_bounds = array<i64: 96, 160>}, {pipeline_mode = #tpu.pipeline_mode<synchronous>, transform_indices = @transform_9, window_bounds = array<i64: 16, 160>}, {pipeline_mode = #tpu.pipeline_mode<synchronous>, transform_indices = @transform_10, window_bounds = array<i64: 32, 32>}, {pipeline_mode = #tpu.pipeline_mode<synchronous>, transform_indices = @transform_11, window_bounds = array<i64: 1, 192>}, {transform_indices = @transform_12, window_bounds = array<i64: 8, 256>}]} {
    %c0 = arith.constant 0 : index
    %c0_0 = arith.constant 0 : index
    %0 = vector.load %arg3[%c0, %c0_0] : memref<8x128xbf16, #tpu.memory_space<vmem>>, vector<8x128xbf16>
    %c0_1 = arith.constant 0 : index
    %c0_2 = arith.constant 0 : index
    %1 = vector.load %arg8[%c0_1, %c0_2] : memref<128x64xbf16, #tpu.memory_space<vmem>>, vector<128x64xbf16>
    %cst = arith.constant dense<0.000000e+00> : vector<8x64xf32>
    %2 = tpu.matmul %0, %1, %cst {dimension_numbers = #tpu.dot_dimension_numbers<[1], [0], [0], [1], [0, 0, 1, 1], [], []>} : vector<8x128xbf16>, vector<128x64xbf16>, vector<8x64xf32> -> vector<8x64xf32>
    %c0_3 = arith.constant 0 : index
    %c0_4 = arith.constant 0 : index
    %3 = vector.load %arg12[%c0_3, %c0_4] : memref<1x192xf32, #tpu.memory_space<vmem>>, vector<1x64xf32>
    %4 = vector.broadcast %3 : vector<1x64xf32> to vector<8x64xf32>
    %5 = arith.addf %2, %4 : vector<8x64xf32>
    %6 = math.tanh %5 : vector<8x64xf32>
    %7 = vector.extract_strided_slice %6 {offsets = [0, 0], sizes = [8, 32], strides = [1, 1]} : vector<8x64xf32> to vector<8x32xf32>
    %8 = vector.extract_strided_slice %6 {offsets = [0, 32], sizes = [8, 32], strides = [1, 1]} : vector<8x64xf32> to vector<8x32xf32>
    %c0_5 = arith.constant 0 : index
    %c0_6 = arith.constant 0 : index
    %c0_7 = arith.constant 0 : index
    %9 = vector.load %arg2[%c0_5, %c0_6, %c0_7] : memref<8x8x64xbf16, #tpu.memory_space<vmem>>, vector<8x8x64xbf16>
    %10 = vector.shape_cast %9 : vector<8x8x64xbf16> to vector<64x64xbf16>
    %c0_8 = arith.constant 0 : index
    %c0_9 = arith.constant 0 : index
    %11 = vector.load %arg5[%c0_8, %c0_9] : memref<64x32xbf16, #tpu.memory_space<vmem>>, vector<64x32xbf16>
    %cst_10 = arith.constant dense<0.000000e+00> : vector<64x32xf32>
    %12 = tpu.matmul %10, %11, %cst_10 {dimension_numbers = #tpu.dot_dimension_numbers<[1], [0], [0], [1], [0, 0, 1, 1], [], []>} : vector<64x64xbf16>, vector<64x32xbf16>, vector<64x32xf32> -> vector<64x32xf32>
    %13 = arith.truncf %7 : vector<8x32xf32> to vector<8x32xbf16>
    %c0_11 = arith.constant 0 : index
    %c0_12 = arith.constant 0 : index
    %14 = vector.load %arg6[%c0_11, %c0_12] : memref<32x32xbf16, #tpu.memory_space<vmem>>, vector<32x32xbf16>
    %cst_13 = arith.constant dense<0.000000e+00> : vector<8x32xf32>
    %15 = tpu.matmul %13, %14, %cst_13 {dimension_numbers = #tpu.dot_dimension_numbers<[1], [0], [0], [1], [0, 0, 1, 1], [], []>} : vector<8x32xbf16>, vector<32x32xbf16>, vector<8x32xf32> -> vector<8x32xf32>
    %16 = vector.shape_cast %15 : vector<8x32xf32> to vector<1x8x32xf32>
    %17 = vector.shape_cast %16 : vector<1x8x32xf32> to vector<1x8x32xf32>
    %18 = vector.broadcast %17 : vector<1x8x32xf32> to vector<8x8x32xf32>
    %19 = vector.shape_cast %18 : vector<8x8x32xf32> to vector<64x32xf32>
    %20 = arith.addf %12, %19 : vector<64x32xf32>
    %21 = math.tanh %20 : vector<64x32xf32>
    %c0_14 = arith.constant 0 : index
    %c0_15 = arith.constant 0 : index
    %22 = vector.load %arg7[%c0_14, %c0_15] : memref<1x32xf32, #tpu.memory_space<vmem>>, vector<1x32xf32>
    %23 = vector.broadcast %22 : vector<1x32xf32> to vector<64x32xf32>
    %24 = arith.mulf %21, %23 : vector<64x32xf32>
    %cst_16 = arith.constant dense<0.000000e+00> : vector<64xf32>
    %25 = vector.multi_reduction <add>, %24, %cst_16 [1] : vector<64x32xf32> to vector<64xf32>
    %26 = vector.shape_cast %25 : vector<64xf32> to vector<64x1xf32>
    %27 = vector.shape_cast %26 : vector<64x1xf32> to vector<8x8x1xf32>
    %c0_17 = arith.constant 0 : index
    %c0_18 = arith.constant 0 : index
    %c0_19 = arith.constant 0 : index
    %28 = vector.load %arg4[%c0_17, %c0_18, %c0_19] : memref<8x8x1xf32, #tpu.memory_space<vmem>>, vector<8x8x1xf32>
    %cst_20 = arith.constant 0.000000e+00 : f32
    %29 = vector.broadcast %cst_20 : f32 to vector<8x8x1xf32>
    %30 = arith.cmpf ogt, %28, %29 : vector<8x8x1xf32>
    %cst_21 = arith.constant -1.000000e+30 : f32
    %31 = vector.broadcast %cst_21 : f32 to vector<8x8x1xf32>
    %32 = arith.select %30, %27, %31 : vector<8x8x1xi1>, vector<8x8x1xf32>
    %cst_22 = arith.constant dense<0xFF800000> : vector<8x1xf32>
    %33 = vector.multi_reduction <maximumf>, %32, %cst_22 [0] : vector<8x8x1xf32> to vector<8x1xf32>
    %34 = vector.shape_cast %33 : vector<8x1xf32> to vector<1x8x1xf32>
    %35 = vector.broadcast %34 : vector<1x8x1xf32> to vector<8x8x1xf32>
    %36 = arith.subf %32, %35 : vector<8x8x1xf32>
    %37 = math.exp %36 : vector<8x8x1xf32>
    %cst_23 = arith.constant dense<0.000000e+00> : vector<8x1xf32>
    %38 = vector.multi_reduction <add>, %37, %cst_23 [0] : vector<8x8x1xf32> to vector<8x1xf32>
    %39 = vector.shape_cast %38 : vector<8x1xf32> to vector<1x8x1xf32>
    %40 = vector.broadcast %39 : vector<1x8x1xf32> to vector<8x8x1xf32>
    %41 = arith.divf %37, %40 : vector<8x8x1xf32>
    %42 = arith.extf %9 : vector<8x8x64xbf16> to vector<8x8x64xf32>
    %43 = vector.broadcast %41 : vector<8x8x1xf32> to vector<8x8x64xf32>
    %44 = arith.mulf %43, %42 : vector<8x8x64xf32>
    %cst_24 = arith.constant dense<0.000000e+00> : vector<8x64xf32>
    %45 = vector.multi_reduction <add>, %44, %cst_24 [0] : vector<8x8x64xf32> to vector<8x64xf32>
    %c0_25 = arith.constant 0 : index
    %c0_26 = arith.constant 0 : index
    %46 = vector.load %arg9[%c0_25, %c0_26] : memref<96x160xbf16, #tpu.memory_space<vmem>>, vector<96x160xbf16>
    %47 = arith.truncf %45 : vector<8x64xf32> to vector<8x64xbf16>
    %48 = vector.extract_strided_slice %46 {offsets = [0, 0], sizes = [64, 160], strides = [1, 1]} : vector<96x160xbf16> to vector<64x160xbf16>
    %cst_27 = arith.constant dense<0.000000e+00> : vector<8x160xf32>
    %49 = tpu.matmul %47, %48, %cst_27 {dimension_numbers = #tpu.dot_dimension_numbers<[1], [0], [0], [1], [0, 0, 1, 1], [], []>} : vector<8x64xbf16>, vector<64x160xbf16>, vector<8x160xf32> -> vector<8x160xf32>
    %50 = arith.truncf %7 : vector<8x32xf32> to vector<8x32xbf16>
    %51 = vector.extract_strided_slice %46 {offsets = [64, 0], sizes = [32, 160], strides = [1, 1]} : vector<96x160xbf16> to vector<32x160xbf16>
    %cst_28 = arith.constant dense<0.000000e+00> : vector<8x160xf32>
    %52 = tpu.matmul %50, %51, %cst_28 {dimension_numbers = #tpu.dot_dimension_numbers<[1], [0], [0], [1], [0, 0, 1, 1], [], []>} : vector<8x32xbf16>, vector<32x160xbf16>, vector<8x160xf32> -> vector<8x160xf32>
    %53 = arith.addf %49, %52 : vector<8x160xf32>
    %54 = vector.extract_strided_slice %53 {offsets = [0, 0], sizes = [8, 128], strides = [1, 1]} : vector<8x160xf32> to vector<8x128xf32>
    %c0_29 = arith.constant 0 : index
    %c64 = arith.constant 64 : index
    %55 = vector.load %arg12[%c0_29, %c64] : memref<1x192xf32, #tpu.memory_space<vmem>>, vector<1x128xf32>
    %56 = vector.broadcast %55 : vector<1x128xf32> to vector<8x128xf32>
    %57 = arith.addf %54, %56 : vector<8x128xf32>
    %58 = vector.extract_strided_slice %53 {offsets = [0, 128], sizes = [8, 32], strides = [1, 1]} : vector<8x160xf32> to vector<8x32xf32>
    %c0_30 = arith.constant 0 : index
    %c0_31 = arith.constant 0 : index
    %c0_32 = arith.constant 0 : index
    %59 = vector.load %arg1[%c0_30, %c0_31, %c0_32] : memref<8x8x16xbf16, #tpu.memory_space<vmem>>, vector<8x8x16xbf16>
    %60 = vector.shape_cast %59 : vector<8x8x16xbf16> to vector<64x16xbf16>
    %c0_33 = arith.constant 0 : index
    %c0_34 = arith.constant 0 : index
    %61 = vector.load %arg10[%c0_33, %c0_34] : memref<16x160xbf16, #tpu.memory_space<vmem>>, vector<16x160xbf16>
    %cst_35 = arith.constant dense<0.000000e+00> : vector<64x160xf32>
    %62 = tpu.matmul %60, %61, %cst_35 {dimension_numbers = #tpu.dot_dimension_numbers<[1], [0], [0], [1], [0, 0, 1, 1], [], []>} : vector<64x16xbf16>, vector<16x160xbf16>, vector<64x160xf32> -> vector<64x160xf32>
    %63 = vector.extract_strided_slice %62 {offsets = [0, 0], sizes = [64, 128], strides = [1, 1]} : vector<64x160xf32> to vector<64x128xf32>
    %64 = vector.shape_cast %57 : vector<8x128xf32> to vector<1x8x128xf32>
    %65 = vector.shape_cast %64 : vector<1x8x128xf32> to vector<1x8x128xf32>
    %66 = vector.broadcast %65 : vector<1x8x128xf32> to vector<8x8x128xf32>
    %67 = vector.shape_cast %66 : vector<8x8x128xf32> to vector<64x128xf32>
    %68 = arith.addf %63, %67 : vector<64x128xf32>
    %69 = vector.extract_strided_slice %68 {offsets = [0, 0], sizes = [64, 32], strides = [1, 1]} : vector<64x128xf32> to vector<64x32xf32>
    %70 = arith.negf %69 : vector<64x32xf32>
    %71 = math.exp %70 : vector<64x32xf32>
    %cst_36 = arith.constant 1.000000e+00 : f32
    %72 = vector.broadcast %cst_36 : f32 to vector<64x32xf32>
    %73 = arith.addf %72, %71 : vector<64x32xf32>
    %74 = arith.divf %72, %73 : vector<64x32xf32>
    %75 = vector.extract_strided_slice %68 {offsets = [0, 32], sizes = [64, 32], strides = [1, 1]} : vector<64x128xf32> to vector<64x32xf32>
    %76 = arith.negf %75 : vector<64x32xf32>
    %77 = math.exp %76 : vector<64x32xf32>
    %cst_37 = arith.constant 1.000000e+00 : f32
    %78 = vector.broadcast %cst_37 : f32 to vector<64x32xf32>
    %79 = arith.addf %78, %77 : vector<64x32xf32>
    %80 = arith.divf %78, %79 : vector<64x32xf32>
    %81 = vector.extract_strided_slice %68 {offsets = [0, 64], sizes = [64, 32], strides = [1, 1]} : vector<64x128xf32> to vector<64x32xf32>
    %82 = math.tanh %81 : vector<64x32xf32>
    %83 = vector.extract_strided_slice %68 {offsets = [0, 96], sizes = [64, 32], strides = [1, 1]} : vector<64x128xf32> to vector<64x32xf32>
    %84 = arith.negf %83 : vector<64x32xf32>
    %85 = math.exp %84 : vector<64x32xf32>
    %cst_38 = arith.constant 1.000000e+00 : f32
    %86 = vector.broadcast %cst_38 : f32 to vector<64x32xf32>
    %87 = arith.addf %86, %85 : vector<64x32xf32>
    %88 = arith.divf %86, %87 : vector<64x32xf32>
    %89 = vector.shape_cast %8 : vector<8x32xf32> to vector<1x8x32xf32>
    %90 = vector.shape_cast %89 : vector<1x8x32xf32> to vector<1x8x32xf32>
    %91 = vector.broadcast %90 : vector<1x8x32xf32> to vector<8x8x32xf32>
    %92 = vector.shape_cast %91 : vector<8x8x32xf32> to vector<64x32xf32>
    %93 = arith.mulf %80, %92 : vector<64x32xf32>
    %94 = arith.mulf %74, %82 : vector<64x32xf32>
    %95 = arith.addf %93, %94 : vector<64x32xf32>
    %96 = math.tanh %95 : vector<64x32xf32>
    %97 = arith.mulf %88, %96 : vector<64x32xf32>
    %98 = vector.extract_strided_slice %62 {offsets = [0, 128], sizes = [64, 32], strides = [1, 1]} : vector<64x160xf32> to vector<64x32xf32>
    %99 = arith.truncf %97 : vector<64x32xf32> to vector<64x32xbf16>
    %c0_39 = arith.constant 0 : index
    %c0_40 = arith.constant 0 : index
    %100 = vector.load %arg11[%c0_39, %c0_40] : memref<32x32xbf16, #tpu.memory_space<vmem>>, vector<32x32xbf16>
    %cst_41 = arith.constant dense<0.000000e+00> : vector<64x32xf32>
    %101 = tpu.matmul %99, %100, %cst_41 {dimension_numbers = #tpu.dot_dimension_numbers<[1], [0], [0], [1], [0, 0, 1, 1], [], []>} : vector<64x32xbf16>, vector<32x32xbf16>, vector<64x32xf32> -> vector<64x32xf32>
    %102 = arith.addf %98, %101 : vector<64x32xf32>
    %103 = vector.shape_cast %58 : vector<8x32xf32> to vector<1x8x32xf32>
    %104 = vector.shape_cast %103 : vector<1x8x32xf32> to vector<1x8x32xf32>
    %105 = vector.broadcast %104 : vector<1x8x32xf32> to vector<8x8x32xf32>
    %106 = vector.shape_cast %105 : vector<8x8x32xf32> to vector<64x32xf32>
    %107 = arith.addf %102, %106 : vector<64x32xf32>
    %108 = vector.shape_cast %107 : vector<64x32xf32> to vector<8x8x32xf32>
    %109 = vector.extract_strided_slice %108 {offsets = [0, 0, 0], sizes = [1, 8, 32], strides = [1, 1, 1]} : vector<8x8x32xf32> to vector<1x8x32xf32>
    %110 = vector.shape_cast %109 : vector<1x8x32xf32> to vector<8x32xf32>
    %c0_42 = arith.constant 0 : index
    %c0_43 = arith.constant 0 : index
    %111 = vector.load %arg13[%c0_42, %c0_43] : memref<8x256xf32, #tpu.memory_space<vmem>>, vector<8x32xf32>
    tpu.vector_store %arg13[%c0_42, %c0_43], %110 {strides = array<i32>} : memref<8x256xf32, #tpu.memory_space<vmem>>, vector<8x32xf32>,
    %112 = vector.extract_strided_slice %108 {offsets = [1, 0, 0], sizes = [1, 8, 32], strides = [1, 1, 1]} : vector<8x8x32xf32> to vector<1x8x32xf32>
    %113 = vector.shape_cast %112 : vector<1x8x32xf32> to vector<8x32xf32>
    %c0_44 = arith.constant 0 : index
    %c32 = arith.constant 32 : index
    %114 = vector.load %arg13[%c0_44, %c32] : memref<8x256xf32, #tpu.memory_space<vmem>>, vector<8x32xf32>
    tpu.vector_store %arg13[%c0_44, %c32], %113 {strides = array<i32>} : memref<8x256xf32, #tpu.memory_space<vmem>>, vector<8x32xf32>,
    %115 = vector.extract_strided_slice %108 {offsets = [2, 0, 0], sizes = [1, 8, 32], strides = [1, 1, 1]} : vector<8x8x32xf32> to vector<1x8x32xf32>
    %116 = vector.shape_cast %115 : vector<1x8x32xf32> to vector<8x32xf32>
    %c0_45 = arith.constant 0 : index
    %c64_46 = arith.constant 64 : index
    %117 = vector.load %arg13[%c0_45, %c64_46] : memref<8x256xf32, #tpu.memory_space<vmem>>, vector<8x32xf32>
    tpu.vector_store %arg13[%c0_45, %c64_46], %116 {strides = array<i32>} : memref<8x256xf32, #tpu.memory_space<vmem>>, vector<8x32xf32>,
    %118 = vector.extract_strided_slice %108 {offsets = [3, 0, 0], sizes = [1, 8, 32], strides = [1, 1, 1]} : vector<8x8x32xf32> to vector<1x8x32xf32>
    %119 = vector.shape_cast %118 : vector<1x8x32xf32> to vector<8x32xf32>
    %c0_47 = arith.constant 0 : index
    %c96 = arith.constant 96 : index
    %120 = vector.load %arg13[%c0_47, %c96] : memref<8x256xf32, #tpu.memory_space<vmem>>, vector<8x32xf32>
    tpu.vector_store %arg13[%c0_47, %c96], %119 {strides = array<i32>} : memref<8x256xf32, #tpu.memory_space<vmem>>, vector<8x32xf32>,
    %121 = vector.extract_strided_slice %108 {offsets = [4, 0, 0], sizes = [1, 8, 32], strides = [1, 1, 1]} : vector<8x8x32xf32> to vector<1x8x32xf32>
    %122 = vector.shape_cast %121 : vector<1x8x32xf32> to vector<8x32xf32>
    %c0_48 = arith.constant 0 : index
    %c128 = arith.constant 128 : index
    %123 = vector.load %arg13[%c0_48, %c128] : memref<8x256xf32, #tpu.memory_space<vmem>>, vector<8x32xf32>
    tpu.vector_store %arg13[%c0_48, %c128], %122 {strides = array<i32>} : memref<8x256xf32, #tpu.memory_space<vmem>>, vector<8x32xf32>,
    %124 = vector.extract_strided_slice %108 {offsets = [5, 0, 0], sizes = [1, 8, 32], strides = [1, 1, 1]} : vector<8x8x32xf32> to vector<1x8x32xf32>
    %125 = vector.shape_cast %124 : vector<1x8x32xf32> to vector<8x32xf32>
    %c0_49 = arith.constant 0 : index
    %c160 = arith.constant 160 : index
    %126 = vector.load %arg13[%c0_49, %c160] : memref<8x256xf32, #tpu.memory_space<vmem>>, vector<8x32xf32>
    tpu.vector_store %arg13[%c0_49, %c160], %125 {strides = array<i32>} : memref<8x256xf32, #tpu.memory_space<vmem>>, vector<8x32xf32>,
    %127 = vector.extract_strided_slice %108 {offsets = [6, 0, 0], sizes = [1, 8, 32], strides = [1, 1, 1]} : vector<8x8x32xf32> to vector<1x8x32xf32>
    %128 = vector.shape_cast %127 : vector<1x8x32xf32> to vector<8x32xf32>
    %c0_50 = arith.constant 0 : index
    %c192 = arith.constant 192 : index
    %129 = vector.load %arg13[%c0_50, %c192] : memref<8x256xf32, #tpu.memory_space<vmem>>, vector<8x32xf32>
    tpu.vector_store %arg13[%c0_50, %c192], %128 {strides = array<i32>} : memref<8x256xf32, #tpu.memory_space<vmem>>, vector<8x32xf32>,
    %130 = vector.extract_strided_slice %108 {offsets = [7, 0, 0], sizes = [1, 8, 32], strides = [1, 1, 1]} : vector<8x8x32xf32> to vector<1x8x32xf32>
    %131 = vector.shape_cast %130 : vector<1x8x32xf32> to vector<8x32xf32>
    %c0_51 = arith.constant 0 : index
    %c224 = arith.constant 224 : index
    %132 = vector.load %arg13[%c0_51, %c224] : memref<8x256xf32, #tpu.memory_space<vmem>>, vector<8x32xf32>
    tpu.vector_store %arg13[%c0_51, %c224], %131 {strides = array<i32>} : memref<8x256xf32, #tpu.memory_space<vmem>>, vector<8x32xf32>,
    return
  }
  func.func @transform_0(%arg0: i32) -> (i32, i32, i32) {
    %c0_i32 = arith.constant 0 : i32
    %c0_i32_0 = arith.constant 0 : i32
    %c0_i32_1 = arith.constant 0 : i32
    return %c0_i32, %arg0, %c0_i32_0 : i32, i32, i32
  }
  func.func @transform_1(%arg0: i32) -> (i32, i32, i32) {
    %c0_i32 = arith.constant 0 : i32
    %c0_i32_0 = arith.constant 0 : i32
    %c0_i32_1 = arith.constant 0 : i32
    return %c0_i32, %arg0, %c0_i32_0 : i32, i32, i32
  }
  func.func @transform_2(%arg0: i32) -> (i32, i32) {
    %c0_i32 = arith.constant 0 : i32
    %c0_i32_0 = arith.constant 0 : i32
    return %arg0, %c0_i32 : i32, i32
  }
  func.func @transform_3(%arg0: i32) -> (i32, i32, i32) {
    %c0_i32 = arith.constant 0 : i32
    %c0_i32_0 = arith.constant 0 : i32
    %c0_i32_1 = arith.constant 0 : i32
    return %c0_i32, %arg0, %c0_i32_0 : i32, i32, i32
  }
  func.func @transform_4(%arg0: i32) -> (i32, i32) {
    %c0_i32 = arith.constant 0 : i32
    %c0_i32_0 = arith.constant 0 : i32
    %c0_i32_1 = arith.constant 0 : i32
    return %c0_i32, %c0_i32_0 : i32, i32
  }
  func.func @transform_5(%arg0: i32) -> (i32, i32) {
    %c0_i32 = arith.constant 0 : i32
    %c0_i32_0 = arith.constant 0 : i32
    %c0_i32_1 = arith.constant 0 : i32
    return %c0_i32, %c0_i32_0 : i32, i32
  }
  func.func @transform_6(%arg0: i32) -> (i32, i32) {
    %c0_i32 = arith.constant 0 : i32
    %c0_i32_0 = arith.constant 0 : i32
    %c0_i32_1 = arith.constant 0 : i32
    return %c0_i32, %c0_i32_0 : i32, i32
  }
  func.func @transform_7(%arg0: i32) -> (i32, i32) {
    %c0_i32 = arith.constant 0 : i32
    %c0_i32_0 = arith.constant 0 : i32
    %c0_i32_1 = arith.constant 0 : i32
    return %c0_i32, %c0_i32_0 : i32, i32
  }
  func.func @transform_8(%arg0: i32) -> (i32, i32) {
    %c0_i32 = arith.constant 0 : i32
    %c0_i32_0 = arith.constant 0 : i32
    %c0_i32_1 = arith.constant 0 : i32
    return %c0_i32, %c0_i32_0 : i32, i32
  }
  func.func @transform_9(%arg0: i32) -> (i32, i32) {
    %c0_i32 = arith.constant 0 : i32
    %c0_i32_0 = arith.constant 0 : i32
    %c0_i32_1 = arith.constant 0 : i32
    return %c0_i32, %c0_i32_0 : i32, i32
  }
  func.func @transform_10(%arg0: i32) -> (i32, i32) {
    %c0_i32 = arith.constant 0 : i32
    %c0_i32_0 = arith.constant 0 : i32
    %c0_i32_1 = arith.constant 0 : i32
    return %c0_i32, %c0_i32_0 : i32, i32
  }
  func.func @transform_11(%arg0: i32) -> (i32, i32) {
    %c0_i32 = arith.constant 0 : i32
    %c0_i32_0 = arith.constant 0 : i32
    %c0_i32_1 = arith.constant 0 : i32
    return %c0_i32, %c0_i32_0 : i32, i32
  }
  func.func @transform_12(%arg0: i32) -> (i32, i32) {
    %c0_i32 = arith.constant 0 : i32
    %c0_i32_0 = arith.constant 0 : i32
    return %arg0, %c0_i32 : i32, i32
  }
}

</mosaic_0001>

<bundles_post_ra>
// kernel: tpu_custom_call.1
= control target key start
LH: loop header
LB: loop body
LE: loop exit
PB: predicated region body
PF: predicated region fallthrough
CT: control target
= control target key end

     0   :  { %s2937_s0 = inlined_call_operand.vmem [shape: bf16[8,16,16], index: 0, kind: input, shape index: {}]   ;;  %s2938_s1 = inlined_call_operand.vmem [shape: bf16[8,16,64], index: 1, kind: input, shape index: {}]   ;;  %s2939_s2 = inlined_call_operand.vmem [shape: bf16[16,128], index: 2, kind: input, shape index: {}]   ;;  %s2940_s3 = inlined_call_operand.vmem [shape: f32[8,16,1], index: 3, kind: input, shape index: {}]   ;;  %s2941_s4 = inlined_call_operand.vmem [shape: bf16[64,32], index: 4, kind: input, shape index: {}]   ;;  %s2942_s5 = inlined_call_operand.vmem [shape: bf16[32,32], index: 5, kind: input, shape index: {}]   ;;  %s2943_s6 = inlined_call_operand.vmem [shape: f32[1,32], index: 6, kind: input, shape index: {}]   ;;  %s2944_s7 = inlined_call_operand.vmem [shape: bf16[128,64], index: 7, kind: input, shape index: {}]   ;;  %s2945_s8 = inlined_call_operand.vmem [shape: bf16[96,160], index: 8, kind: input, shape index: {}]   ;;  %s2946_s9 = inlined_call_operand.vmem [shape: bf16[16,160], index: 9, kind: input, shape index: {}]   ;;  %s2947_s10 = inlined_call_operand.vmem [shape: bf16[32,32], index: 10, kind: input, shape index: {}]   ;;  %s2948_s11 = inlined_call_operand.vmem [shape: f32[1,192], index: 11, kind: input, shape index: {}]   ;;  %s2949_s12 = inlined_call_operand.hbm [shape: f32[16,256], index: 12, kind: output, shape index: {}]  }
   0x1   :  { %2950 = sst [smem:[#allocation8_spill]] %s2937_s0 }
   0x2   :  { %2951 = sst [smem:[#allocation9_spill]] %s2938_s1 }
   0x3   :  { %2952 = sst [smem:[#allocation10_spill]] %s2940_s3 }
   0x4   :  { %17 = vsyncpa [#allocation6], 0 }
   0x5   :  { %19 = vsyncpa [#allocation6 + $0x1], 0  ;;  %s2477_s21 = smov 0   ;;  %s2479_s22 = smov 0  }
   0x6   :  { %s2481_s23 = smov 0   ;;  %s2483_s24 = smov 0  }
   0x7 LB: > { %s2498_s25 = sadd.s32 4294967295, %s2403_s24   ;;  %s1977_s26 = sadd.s32 4294967294, %s2403_s24   ;;  %s2403_s24 = sphi %s2483_s24, %s2962_s24   ;;  %s2399_s23 = sphi %s2481_s23, %s2961_s23   ;;  %s2395_s22 = sphi %s2479_s22, %s2960_s22   ;;  %s2391_s21 = sphi %s2477_s21, %s2959_s21  }
   0x8   : > { %s2502_s27 = sadd.s32 1, %s2403_s24   ;;  %s32_s28 = sadd.s32 1, %s2399_s23 }
   0x9   : > { %s29_s29 = ssub.s32 %s2403_s24, %s2502_s27  ;;  %p39_p0 = scmp.ne.s32.totalorder %s2399_s23, %s2395_s22 }
   0xa   : > { %p30_p1 = scmp.eq.s32.totalorder %s29_s29, 0  ;;  %p40_p2 = scmp.eq.s32.totalorder %s2403_s24, 0 }
   0xb   : > { %p315_p3 = scmp.eq.s32.totalorder %s2498_s25, 1  ;;  %p320_p4 = scmp.ne.s32.totalorder %s2395_s22, %s2391_s21 }
   0xc   : > { %s2514_s30 = scalar_select %p30_p1, %s2399_s23, %s32_s28  }
   0xd   : > { %p2516_p5 = por %p40_p2, %p39_p0  ;;  %p2520_p6 = por %p315_p3, %p39_p0 }
   0xe   : > { %p321_p7 = scmp.eq.s32.totalorder %s1977_s26, 1  ;;  %p1979_p9 = scmp.ge.s32.totalorder %s2403_s24, 2 }
  0x10   : > { %p2524_p8 = por %p321_p7, %p320_p4  ;;  %361 = sbr.rel (%p1979_p9) target bundleno = 67 (0x43), region = 48 }
  0x17   : > { %364 = sbr.rel (!%p2516_p5) target bundleno = 38 (0x26), region = 52  ;;  %s366_s16 = sand.u32 (%p2516_p5), 1, %s2399_s23  }
  0x18   : > { %s1981_s17 = sshll.u32 (%p2516_p5), %s2403_s24, 2  ;;  %s1980_s18 = sshll.u32 (%p2516_p5), %s366_s16, 5 }
  0x19   : > { %s2956_s0 = sld [smem:[#allocation8_spill]] (%p2516_p5)  ;;  %s368_s28 = scalar_lea.vmem (%p2516_p5), [#allocation2], %s1980_s18 }
  0x1f   : > { %s370_s26 = scalar_lea.vmem %s2956_s0, %s1981_s17 }
  0x20   : > { %v386_v0 = vld [vmem:[%s370_s26] sm:$0xf]  ;;  %v388_v1 = vld [vmem:[%s370_s26 + $0x8] sm:$0xf]  ;;  %v390_v2 = vld [vmem:[%s370_s26 + $0x10] sm:$0xf] }
  0x21   : > { %387 = vst [vmem:[%s368_s28] sm:$0xf] %v386_v0  ;;  %389 = vst [vmem:[%s368_s28 + $0x4] sm:$0xf] %v388_v1  ;;  %v392_v3 = vld [vmem:[%s370_s26 + $0x18] sm:$0xf] }
  0x22   : > { %v394_v4 = vld [vmem:[%s370_s26 + $0x20] sm:$0xf]  ;;  %391 = vst [vmem:[%s368_s28 + $0x8] sm:$0xf] %v390_v2  ;;  %393 = vst [vmem:[%s368_s28 + $0xc] sm:$0xf] %v392_v3 }
  0x23   : > { %395 = vst [vmem:[%s368_s28 + $0x10] sm:$0xf] %v394_v4  ;;  %v396_v5 = vld [vmem:[%s370_s26 + $0x28] sm:$0xf]  ;;  %v398_v6 = vld [vmem:[%s370_s26 + $0x30] sm:$0xf] }
  0x24   : > { %v400_v7 = vld [vmem:[%s370_s26 + $0x38] sm:$0xf]  ;;  %397 = vst [vmem:[%s368_s28 + $0x14] sm:$0xf] %v396_v5  ;;  %399 = vst [vmem:[%s368_s28 + $0x18] sm:$0xf] %v398_v6 }
  0x25   : > { %401 = vst [vmem:[%s368_s28 + $0x1c] sm:$0xf] %v400_v7 }
  0x26 PF: > { %440 = sbr.rel (!%p2516_p5) target bundleno = 53 (0x35), region = 93  ;;  %s442_s29 = sand.u32 (%p2516_p5), 1, %s2399_s23  }
  0x27   : > { %s1983_s16 = sshll.u32 (%p2516_p5), %s2403_s24, 2  ;;  %s1982_s17 = sshll.u32 (%p2516_p5), %s442_s29, 5 }
  0x28   : > { %s2957_s1 = sld [smem:[#allocation9_spill]] (%p2516_p5)  ;;  %s444_s0 = scalar_lea.vmem (%p2516_p5), [#allocation3], %s1982_s17 }
  0x2e   : > { %s446_s20 = scalar_lea.vmem %s2957_s1, %s1983_s16 }
  0x2f   : > { %v462_v8 = vld [vmem:[%s446_s20] sm:$0xf]  ;;  %v464_v9 = vld [vmem:[%s446_s20 + $0x8] sm:$0xf]  ;;  %v466_v10 = vld [vmem:[%s446_s20 + $0x10] sm:$0xf] }
  0x30   : > { %463 = vst [vmem:[%s444_s0] sm:$0xf] %v462_v8  ;;  %465 = vst [vmem:[%s444_s0 + $0x4] sm:$0xf] %v464_v9  ;;  %v468_v11 = vld [vmem:[%s446_s20 + $0x18] sm:$0xf] }
  0x31   : > { %v470_v12 = vld [vmem:[%s446_s20 + $0x20] sm:$0xf]  ;;  %467 = vst [vmem:[%s444_s0 + $0x8] sm:$0xf] %v466_v10  ;;  %469 = vst [vmem:[%s444_s0 + $0xc] sm:$0xf] %v468_v11 }
  0x32   : > { %471 = vst [vmem:[%s444_s0 + $0x10] sm:$0xf] %v470_v12  ;;  %v472_v13 = vld [vmem:[%s446_s20 + $0x28] sm:$0xf]  ;;  %v474_v14 = vld [vmem:[%s446_s20 + $0x30] sm:$0xf] }
  0x33   : > { %v476_v15 = vld [vmem:[%s446_s20 + $0x38] sm:$0xf]  ;;  %473 = vst [vmem:[%s444_s0 + $0x14] sm:$0xf] %v472_v13  ;;  %475 = vst [vmem:[%s444_s0 + $0x18] sm:$0xf] %v474_v14 }
  0x34   : > { %477 = vst [vmem:[%s444_s0 + $0x1c] sm:$0xf] %v476_v15 }
  0x35 PF: > { %523 = sbr.rel (!%p2516_p5) target bundleno = 67 (0x43), region = 138  ;;  %s525_s26 = sand.u32 (%p2516_p5), 1, %s2399_s23  }
  0x36   : > { %s1985_s28 = sshll.u32 (%p2516_p5), %s2403_s24, 3  ;;  %s1984_s29 = sshll.u32 (%p2516_p5), %s525_s26, 6 }
  0x37   : > { %s2958_s3 = sld [smem:[#allocation10_spill]] (%p2516_p5)  ;;  %s527_s19 = scalar_lea.vmem (%p2516_p5), [#allocation4], %s1984_s29 }
  0x3d   : > { %s529_s18 = scalar_lea.vmem %s2958_s3, %s1985_s28 }
  0x3e   : > { %v571_v16 = vld [vmem:[%s529_s18] sm:$0xff]  ;;  %v573_v17 = vld [vmem:[%s529_s18 + $0x10] sm:$0xff] }
  0x3f   : > { %v575_v18 = vld [vmem:[%s529_s18 + $0x20] sm:$0xff]  ;;  %572 = vst [vmem:[%s527_s19] sm:$0xff] %v571_v16  ;;  %574 = vst [vmem:[%s527_s19 + $0x8] sm:$0xff] %v573_v17  ;;  %v577_v19 = vld [vmem:[%s529_s18 + $0x30] sm:$0xff] }
  0x40   : > { %576 = vst [vmem:[%s527_s19 + $0x10] sm:$0xff] %v575_v18  ;;  %v579_v20 = vld [vmem:[%s529_s18 + $0x40] sm:$0xff]  ;;  %v581_v21 = vld [vmem:[%s529_s18 + $0x50] sm:$0xff]  ;;  %578 = vst [vmem:[%s527_s19 + $0x18] sm:$0xff] %v577_v19 }
  0x41   : > { %580 = vst [vmem:[%s527_s19 + $0x20] sm:$0xff] %v579_v20  ;;  %582 = vst [vmem:[%s527_s19 + $0x28] sm:$0xff] %v581_v21  ;;  %v583_v22 = vld [vmem:[%s529_s18 + $0x60] sm:$0xff]  ;;  %v585_v23 = vld [vmem:[%s529_s18 + $0x70] sm:$0xff] }
  0x42   : > { %584 = vst [vmem:[%s527_s19 + $0x30] sm:$0xff] %v583_v22  ;;  %586 = vst [vmem:[%s527_s19 + $0x38] sm:$0xff] %v585_v23 }
  0x43 PF: > { %p1986_p10 = scmp.ge.s32.totalorder %s2403_s24, 1  ;;  %p591_p11 = scmp.lt.s32.totalorder %s2403_s24, 3 }
  0x45   : > { %p592_p12 = pnand %p1986_p10, %p591_p11 }
  0x46   : > { %v2192_v24 = vld [vmem:[%s2944_s7] sm:$0xff] (!%p592_p12)   ;;  %v2405_v25 = vmov (!%p592_p12), 0.0   ;;  %v2193_v26 = vld [vmem:[%s2944_s7 + $0x8] sm:$0xff] (!%p592_p12)   ;;  %vm2406_vm0 = vmmov (!%p592_p12), 0   ;;  %v2194_v27 = vld [vmem:[%s2944_s7 + $0x10] sm:$0xff] (!%p592_p12)   ;;  %p665_p13 = scmp.lt.s32.totalorder (!%p592_p12), %s2498_s25, 1 }
  0x47   : > { %595 = sbr.rel (%p592_p12) target bundleno = 2016 (0x7e0), region = 176  ;;  %2087 = vmatprep.subr.bf16.mxu0 (!%p592_p12), %v2405_v25  ;;  %2107 = vmatprep.subr.bf16.mxu1 (!%p592_p12), %v2405_v25  ;;  %v2195_v28 = vld [vmem:[%s2944_s7 + $0x18] sm:$0xff] (!%p592_p12)   ;;  %v2196_v29 = vld [vmem:[%s2944_s7 + $0x20] sm:$0xff] (!%p592_p12)   ;;  %v2197_v30 = vld [vmem:[%s2944_s7 + $0x28] sm:$0xff] (!%p592_p12)   ;;  %v2407_v38 = vmov (!%p592_p12), 0   ;;  %s2608_s13 = sand.u32 (!%p592_p12), 1, %s2395_s22  }
  0x48   : > { %2088 = vmatpush3.bf16.msra.mxu0 (!%p592_p12), %v2192_v24  ;;  %2103 = vmatprep.mubr.msk.bf16.mxu0 (!%p592_p12), %vm2406_vm0, %v2405_v25  ;;  %v2198_v31 = vld [vmem:[%s2944_s7 + $0x30] sm:$0xff] (!%p592_p12)   ;;  %v2199_v32 = vld [vmem:[%s2944_s7 + $0x38] sm:$0xff] (!%p592_p12)   ;;  %v2200_v34 = vld [vmem:[%s2942_s5] sm:$0xff] (!%p592_p12)   ;;  %s1987_s26 = sshll.u32 (!%p592_p12), %s2608_s13, 5  ;;  %vm816_vm1 = vcmask (!%p592_p12), 261120   ;;  %vm904_vm2 = vcmask (!%p592_p12), 523264  }
  0x49   : > { %2089 = vmatprep.subr.bf16.mxu0 (!%p592_p12), %v2405_v25  ;;  %2111 = vmatprep.mubr.msk.bf16.mxu1 (!%p592_p12), %vm2406_vm0, %v2405_v25  ;;  %v2201_v35 = vld [vmem:[%s2945_s8 + $0x40] ss:$8 sps:$4 sm:$0xff] (!%p592_p12)   ;;  %v2203_v36 = vld [vmem:[%s2945_s8 + $0x44] ss:$8 sps:$4 sm:$0xff] (!%p592_p12)   ;;  %v2207_v37 = vld [vmem:[%s2945_s8 + $0x54] ss:$8 sps:$4 sm:$0xff] (!%p592_p12)  }
  0x4a   : > { %2191 = vset.pattern.permute.xlu1 (!%p592_p12), %v2407_v38  ;;  %2108 = vmatpush3.bf16.msra.mxu1 (!%p592_p12), %v2200_v34  ;;  %v2204_v39 = vld [vmem:[%s2942_s5 + $0x8] sm:$0xff] (!%p592_p12)   ;;  %v2205_v40 = vld [vmem:[%s2945_s8 + $0x50] ss:$8 sps:$4 sm:$0xff] (!%p592_p12)   ;;  %v2208_v41 = vld [vmem:[%s2941_s4] sm:$0xff] (!%p592_p12)   ;;  %s2611_s28 = scalar_lea.vmem (!%p592_p12), [#allocation2], %s1987_s26  ;;  %s607_s17 = scalar_lea.vmem (!%p592_p12), [#allocation3], %s1987_s26 }
  0x4b   : > { %2109 = vmatprep.subr.bf16.mxu1 (!%p592_p12), %v2405_v25  ;;  %2190 = vset.pattern.permute.xlu0 (!%p592_p12), %v2407_v38  ;;  %v1992_v42 = vld [vmem:[%s2948_s11] ss:$0 sm:$0xff] (!%p592_p12)  ;;  %v2209_v51 = vld [vmem:[%s2941_s4 + $0x8] sm:$0xff] (!%p592_p12)   ;;  %v2210_v52 = vld [vmem:[%s2941_s4 + $0x10] sm:$0xff] (!%p592_p12)   ;;  %s1989_s16 = sshll.u32 (!%p592_p12), %s2608_s13, 6  ;;  %vm1053_vm7 = vcmask (!%p592_p12), 7168  }
  0x4c   : > { %2090 = vmatpush3.bf16.msra.mxu0 (!%p592_p12), %v2193_v26  ;;  %v2616_v48 = vld [vmem:[%s607_s17] sm:$0xff] (!%p592_p12)   ;;  %v2211_v53 = vld [vmem:[%s2941_s4 + $0x18] sm:$0xff] (!%p592_p12)   ;;  %v2636_v54 = vld [vmem:[%s607_s17 + $0x8] sm:$0xff] (!%p592_p12)   ;;  %vm1403_vm12 = vcmask (!%p592_p12), 130048   ;;  %s2408_s3 = smov (!%p592_p12), 64   ;;  %vm1819_vm13 = vcmask (!%p592_p12), 523520  }
  0x4d   : > { %2091 = vmatprep.subr.bf16.mxu0 (!%p592_p12), %v2405_v25  ;;  %v2638_v55 = vld [vmem:[%s607_s17 + $0x10] sm:$0xff] (!%p592_p12)   ;;  %v2644_v56 = vld [vmem:[%s607_s17 + $0x18] sm:$0xff] (!%p592_p12)   ;;  %v2016_v16 = vld [vmem:[%s2943_s6] ss:$0 sm:$0xff] (!%p592_p12)  ;;  %s614_s17 = scalar_lea.vmem (!%p592_p12), [#allocation4], %s1989_s16  ;;  %vm1825_vm14 = vcmask (!%p592_p12), 785920  }
  0x4e   : > { %s666_s20 = scalar_select %p665_p13, %s2498_s25, 1  ;;  %2110 = vmatpush3.bf16.msra.mxu1 %v2204_v39  ;;  %vm1831_vm15 = vcmask 1048320  }
  0x4f   : > { %2115 = vmatprep.subr.bf16.mxu1 %v2208_v41  ;;  %s2060_s1 = sshll.u32 %s2498_s25, 8  ;;  %s1850_s19 = scalar_lea.sflag [#allocation6], %s2608_s13 }
  0x50   : > { %2092 = vmatpush3.bf16.msra.mxu0 %v2194_v27  ;;  %s1991_s29 = sshll.u32 %s666_s20, 2  ;;  %s1990_s20 = sshll.u32 %s2608_s13, 4 }
  0x51   : > { %2093 = vmatprep.subr.bf16.mxu0 %v2405_v25  ;;  %s668_s0 = scalar_lea.vmem %s2939_s2, %s1991_s29  ;;  %s2864_s16 = scalar_lea.vmem [#allocation5], %s1990_s20 }
  0x52   : > { %v670_v33 = vld [vmem:[%s668_s0] sm:$0xf]  ;;  %s1864_s29 = sshll.u32 %s2864_s16, 4  ;;  %s2892_s18 = scalar_lea.hbm %s2949_s12, %s2060_s1  ;;  %s2894_s29 = int_to_ptr.vmem [resolvable:$true] %s1864_s29 }
  0x53   : > { %s2341_s0 = scalar_lea.vmem %s2894_s29, 256  ;;  %s2411_s25 = smov [#allocation5]  }
  0x54   : > { %2094 = vmatpush3.bf16.msra.mxu0 %v2195_v28  ;;  %p2342_p0 = scmp.ne.s32.totalorder %s2894_s29, %s2341_s0  ;;  %s2345_s26 = sshll.u32 %s2411_s25, 4  ;;  %s2346_s26 = int_to_ptr.vmem [resolvable:$false] %s2345_s26 }
  0x55   : > { %2095 = vmatprep.subr.bf16.mxu0 %v2405_v25  ;;  %s2347_s20 = scalar_lea.vmem %s2346_s26, 512  ;;  %p2348_p3 = scmp.lt.s32.totalorder %s2894_s29, %s2346_s26 }
  0x56   : > { %p2343_p1 = pnand %p2342_p0, %p2520_p6  ;;  %p2349_p4 = scmp.lt.s32.totalorder %s2347_s20, %s2341_s0 }
  0x58   : > { %2096 = vmatpush3.bf16.msra.mxu0 %v2196_v29  ;;  %p2344_p2 = pneg %p2343_p1  ;;  %p2350_p5 = por %p2349_p4, %p2348_p3 }
  0x59   : > { %2097 = vmatprep.subr.bf16.mxu0 %v2405_v25 }
  0x5a   : > { %p2351_p7 = pnand %p2350_p5, %p2344_p2 }
  0x5c   : > { %2098 = vmatpush3.bf16.msra.mxu0 %v2197_v30 }
  0x5d   : > { %2099 = vmatprep.subr.bf16.mxu0 %v2405_v25 }
  0x60   : > { %2100 = vmatpush3.bf16.msra.mxu0 %v2198_v31 }
  0x61   : > { %2101 = vmatprep.subr.bf16.mxu0 %v2405_v25 }
  0x64   : > { %2102 = vmatpush3.bf16.msra.mxu0 %v2199_v32 }
  0x65   : > { %1221 = vmatprep.subr.bf16.mxu0 %v2203_v36 }
  0x67   : > { %2104 = vmatmul.mubr.bf16.vlgmr.msra.gmra.mrb[0].mxu0 %v670_v33 }
  0x68   : > { %1253 = vmatprep.mubr.bf16.mxu0 %v2407_v38  ;;  %1222 = vmatpush1.bf16.msra.mxu0 %v2201_v35 }
  0x69   : > { %1223 = vmatprep.subr.bf16.mxu0 %v2207_v37 }
  0x6c   : > { %1224 = vmatpush1.bf16.msra.mxu0 %v2205_v40 }
 0x13a   : > { %v776_v43 = vpop.f32.mrb[0].mxu0 }
 0x13b   : > { %v777_v44 = vadd.f32 %v1992_v42, %v776_v43  ;;  %v2105_v45 = vpop.f32.mrb[1].mxu0 }
 0x13c   : > { %v779_v46 = vpop.f32.mrb[2].mxu0 }
 0x13d   : > { %2241 = vtanh.f32 %v777_v44  ;;  %v2106_v47 = vpop.f32.mrb[3].mxu0  ;;  %v1030_v46 = vld [vmem:[%s614_s17 + $0x8] sm:$0xff] }
 0x13e   : > { %v1033_v47 = vld [vmem:[%s614_s17 + $0x20] sm:$0xff]  ;;  %vm1038_vm3 = vcmp.gt.f32.partialorder %v1030_v46, 0.0 }
 0x13f   : > { %vm1041_vm4 = vcmp.gt.f32.partialorder %v1033_v47, 0.0 }
 0x147   : > { %v2618_v49 = vpop.eup %2241 }
 0x148   : > { %v799_v50 = vpack.c.bf16 %v2618_v49, %v2618_v49 }
 0x14a   : > { %2112 = vmatmul.mubr.msk.bf16.vlgmr.msra.gmra.mrb[0].mxu1 %vm816_vm1, %v799_v50  ;;  %2021 = vmatmul.mubr.msk.bf16.vlgmr.msra.gmra.mrb[4].mxu0 %vm816_vm1, %v799_v50  ;;  %v1034_v50 = vld [vmem:[%s614_s17 + $0x28] sm:$0xff] }
 0x14b   : > { %2116 = vmatpush3.bf16.msra.mxu1 %v2208_v41  ;;  %2123 = vmatprep.mubr.msk.bf16.mxu1 %vm904_vm2, %v2616_v48  ;;  %vm1042_vm5 = vcmp.gt.f32.partialorder %v1034_v50, 0.0 }
 0x14c   : > { %2117 = vmatprep.subr.bf16.mxu1 %v2209_v51  ;;  %1448 = vmatprep.mubr.bf16.mxu0 %v2407_v38 }
 0x14f   : > { %2118 = vmatpush3.bf16.msra.mxu1 %v2209_v51  ;;  %v1031_v51 = vld [vmem:[%s614_s17 + $0x10] sm:$0xff] }
 0x150   : > { %2119 = vmatprep.subr.bf16.mxu1 %v2210_v52  ;;  %vm1039_vm6 = vcmp.gt.f32.partialorder %v1031_v51, 0.0 }
 0x153   : > { %2120 = vmatpush3.bf16.msra.mxu1 %v2210_v52 }
 0x154   : > { %2121 = vmatprep.subr.bf16.mxu1 %v2211_v53 }
 0x157   : > { %2122 = vmatpush3.bf16.msra.mxu1 %v2211_v53  ;;  %v1029_v53 = vld [vmem:[%s614_s17] sm:$0xff] }
 0x158   : > { %vm1037_vm8 = vcmp.gt.f32.partialorder %v1029_v53, 0.0 }
 0x15a   : > { %2124 = vmatmul.mubr.msk.bf16.vlgmr.msra.gmra.mrb[4].mxu1 %vm904_vm2, %v2636_v54 }
 0x15b   : > { %2127 = vmatprep.mubr.msk.bf16.mxu1 %vm904_vm2, %v2638_v55 }
 0x162   : > { %2128 = vmatmul.mubr.msk.bf16.gmra.mrb[8].mxu1 %vm904_vm2, %v2644_v56 }
 0x163   : > { %1337 = vmatprep.mubr.bf16.mxu1 %v2407_v38 }
 0x21d   : > { %v854_v57 = vpop.f32.mrb[0].mxu1  ;;  %v2649_v58 = vpop.f32.mrb[4].mxu0 }
 0x21e   : > { %v2113_v59 = vpop.f32.mrb[1].mxu1  ;;  %v2651_v60 = vpop.f32.mrb[5].mxu0 }
 0x21f   : > { %v857_v61 = vpop.f32.mrb[2].mxu1  ;;  %v1259_v62 = vpop.f32.mrb[6].mxu0  ;;  %v1035_v59 = vld [vmem:[%s614_s17 + $0x30] sm:$0xff] }
 0x220   : > { %v2114_v63 = vpop.f32.mrb[3].mxu1  ;;  %v1260_v0 = vpop.f32.mrb[7].mxu0  ;;  %v1036_v62 = vld [vmem:[%s614_s17 + $0x38] sm:$0xff]  ;;  %vm1043_vm10 = vcmp.gt.f32.partialorder %v1035_v59, 0.0 }
 0x221   : > { %vm1044_vm11 = vcmp.gt.f32.partialorder %v1036_v62, 0.0 }
 0x22d   : > { %v2125_v1 = vpop.f32.mrb[4].mxu1 }
 0x22e   : > { %v960_v2 = vadd.f32 %v2125_v1, %v854_v57  ;;  %v951_v3 = vpop.f32.mrb[5].mxu1 }
 0x22f   : > { %v952_v4 = vadd.f32 %v951_v3, %v854_v57  ;;  %v2126_v5 = vpop.f32.mrb[6].mxu1 }
 0x230   : > { %2243 = vtanh.f32 %v960_v2  ;;  %v963_v6 = vadd.f32 %v2126_v5, %v854_v57  ;;  %v954_v7 = vpop.f32.mrb[7].mxu1 }
 0x231   : > { %2245 = vtanh.f32 %v952_v4  ;;  %v955_v8 = vadd.f32 %v954_v7, %v854_v57 }
 0x232   : > { %2247 = vtanh.f32 %v963_v6 }
 0x233   : > { %2249 = vtanh.f32 %v955_v8 }
 0x235   : > { %v2129_v9 = vpop.f32.mrb[8].mxu1 }
 0x236   : > { %v976_v10 = vadd.f32 %v2129_v9, %v854_v57  ;;  %v967_v11 = vpop.f32.mrb[9].mxu1 }
 0x237   : > { %v968_v12 = vadd.f32 %v967_v11, %v854_v57  ;;  %v2130_v13 = vpop.f32.mrb[10].mxu1 }
 0x238   : > { %2251 = vtanh.f32 %v976_v10  ;;  %v979_v14 = vadd.f32 %v2130_v13, %v854_v57  ;;  %v970_v15 = vpop.f32.mrb[11].mxu1 }
 0x239   : > { %2253 = vtanh.f32 %v968_v12  ;;  %v971_v17 = vadd.f32 %v970_v15, %v854_v57  ;;  %v1032_v57 = vld [vmem:[%s614_s17 + $0x18] sm:$0xff]  ;;  %s2410_s17 = smov 96  }
 0x23a   : > { %v2244_v18 = vpop.eup %2243  ;;  %2255 = vtanh.f32 %v979_v14  ;;  %vm1040_vm9 = vcmp.gt.f32.partialorder %v1032_v57, 0.0 }
 0x23b   : > { %v2246_v19 = vpop.eup %2245  ;;  %2257 = vtanh.f32 %v971_v17  ;;  %v999_v20 = vmul.f32 %v2244_v18, %v2016_v16 }
 0x23c   : > { %v2248_v21 = vpop.eup %2247  ;;  %v997_v22 = vmul.f32 %v2246_v19, %v2016_v16 }
 0x23d   : > { %v2250_v23 = vpop.eup %2249  ;;  %v1011_v24 = vsel %vm816_vm1, %v999_v20, 0.0  ;;  %v1000_v25 = vmul.f32 %v2248_v21, %v2016_v16 }
 0x23e   : > { %1012 = vadd.xlane.f32.xlu1 %v1011_v24  ;;  %v1005_v26 = vsel %vm816_vm1, %v997_v22, 0.0  ;;  %v998_v27 = vmul.f32 %v2250_v23, %v2016_v16 }
 0x23f   : > { %1006 = vadd.xlane.f32.xlu0 %v1005_v26  ;;  %v1014_v28 = vsel %vm816_vm1, %v1000_v25, 0.0 }
 0x240   : > { %v1008_v30 = vsel %vm816_vm1, %v998_v27, 0.0 }
 0x242   : > { %v2252_v29 = vpop.eup %2251  ;;  %1015 = vadd.xlane.f32.xlu1 %v1014_v28 }
 0x243   : > { %v2254_v31 = vpop.eup %2253  ;;  %1009 = vadd.xlane.f32.xlu0 %v1008_v30  ;;  %v1003_v37 = vmul.f32 %v2252_v29, %v2016_v16 }
 0x244   : > { %v2256_v32 = vpop.eup %2255  ;;  %v1001_v33 = vmul.f32 %v2254_v31, %v2016_v16 }
 0x245   : > { %v2258_v34 = vpop.eup %2257  ;;  %v1004_v40 = vmul.f32 %v2256_v32, %v2016_v16  ;;  %v1023_v41 = vsel %vm816_vm1, %v1003_v37, 0.0 }
 0x246   : > { %v1017_v35 = vsel %vm816_vm1, %v1001_v33, 0.0  ;;  %v1002_v36 = vmul.f32 %v2258_v34, %v2016_v16 }
 0x247   : > { %1018 = vadd.xlane.f32.xlu0 %v1017_v35  ;;  %v1026_v42 = vsel %vm816_vm1, %v1004_v40, 0.0 }
 0x248   : > { %v1020_v39 = vsel %vm816_vm1, %v1002_v36, 0.0 }
 0x249   : > { %1021 = vadd.xlane.f32.xlu1 %v1020_v39 }
 0x24b   : > { %1024 = vadd.xlane.f32.xlu0 %v1023_v41 }
 0x24d   : > { %1027 = vadd.xlane.f32.xlu1 %v1026_v42 }
 0x2cb   : > { %v1013_v43 = vpop.xlane.xlu1 %1012 }
 0x2cc   : > { %v1007_v44 = vpop.xlane.xlu0 %1006  ;;  %v1047_v3 = vsel %vm1039_vm6, %v1013_v43, -1e+30 }
 0x2cd   : > { %v1045_v6 = vsel %vm1037_vm8, %v1007_v44, -1e+30  ;;  %v1056_v15 = vsel %vm1053_vm7, %v1047_v3, -inf }
 0x2ce   : > { %v1054_v16 = vsel %vm1053_vm7, %v1045_v6, -inf }
 0x2cf   : > { %v1016_v52 = vpop.xlane.xlu1 %1015 }
 0x2d0   : > { %v1010_v45 = vpop.xlane.xlu0 %1009  ;;  %v1048_v7 = vsel %vm1040_vm9, %v1016_v52, -1e+30 }
 0x2d1   : > { %v1046_v0 = vsel %vm1038_vm3, %v1010_v45, -1e+30  ;;  %v1057_v17 = vsel %vm1053_vm7, %v1048_v7, -inf }
 0x2d2   : > { %v1055_v9 = vsel %vm1053_vm7, %v1046_v0, -inf }
 0x2d4   : > { %v1019_v61 = vpop.xlane.xlu0 %1018 }
 0x2d5   : > { %v1049_v1 = vsel %vm1041_vm4, %v1019_v61, -1e+30 }
 0x2d6   : > { %v1022_v63 = vpop.xlane.xlu1 %1021  ;;  %v1058_v10 = vsel %vm1053_vm7, %v1049_v1, -inf }
 0x2d7   : > { %v1050_v2 = vsel %vm1042_vm5, %v1022_v63, -1e+30  ;;  %v1059_v19 = vmax.f32 %v1054_v16, %v1058_v10  ;;  %v2218_v16 = vld [vmem:[%s2946_s9 + $0x4] ss:$8 sps:$4 sm:$0xff]  }
 0x2d8   : > { %v1060_v4 = vsel %vm1053_vm7, %v1050_v2, -inf  ;;  %v1025_v5 = vpop.xlane.xlu0 %1024  ;;  %1416 = vmatprep.subr.bf16.mxu0 %v2218_v16 }
 0x2d9   : > { %v1051_v8 = vsel %vm1043_vm10, %v1025_v5, -1e+30  ;;  %v1061_v13 = vmax.f32 %v1055_v9, %v1060_v4 }
 0x2da   : > { %v1062_v11 = vsel %vm1053_vm7, %v1051_v8, -inf  ;;  %v1028_v12 = vpop.xlane.xlu1 %1027 }
 0x2db   : > { %v1052_v14 = vsel %vm1044_vm11, %v1028_v12, -1e+30  ;;  %v1063_v20 = vmax.f32 %v1056_v15, %v1062_v11  ;;  %v1066_v22 = vmax.f32 %v1059_v19, %v1061_v13  ;;  %v2684_v15 = vld [vmem:[%s2946_s9] ss:$8 sps:$4 sm:$0xff]  }
 0x2dc   : > { %v1064_v18 = vsel %vm1053_vm7, %v1052_v14, -inf  ;;  %1417 = vmatpush1.bf16.msra.mxu0 %v2684_v15 }
 0x2dd   : > { %v1065_v21 = vmax.f32 %v1057_v17, %v1064_v18  ;;  %v2219_v17 = vld [vmem:[%s2945_s8] ss:$8 sps:$4 sm:$0xff]   ;;  %v2221_v18 = vld [vmem:[%s2945_s8 + $0x4] ss:$8 sps:$4 sm:$0xff]  }
 0x2de   : > { %1305 = vmatprep.subr.bf16.mxu1 %v2221_v18 }
 0x2df   : > { %v1067_v23 = vmax.f32 %v1063_v20, %v1065_v21  ;;  %1306 = vmatpush1.bf16.msra.mxu1 %v2219_v17  ;;  %v2222_v20 = vld [vmem:[%s2611_s28] sm:$0xff]   ;;  %v2223_v21 = vld [vmem:[%s2945_s8 + $0x10] ss:$8 sps:$4 sm:$0xff]  }
 0x2e0   : > { %2037 = vmatmul.mubr.msk.bf16.vlgmr.msra.gmra.mrb[8].mxu0 %vm1403_vm12, %v2222_v20 }
 0x2e1   : > { %v1068_v24 = vmax.f32 %v1066_v22, %v1067_v23  ;;  %v2225_v22 = vld [vmem:[%s2945_s8 + $0x14] ss:$8 sps:$4 sm:$0xff]   ;;  %1458 = vmatprep.mubr.bf16.mxu0 %v2407_v38 }
 0x2e2   : > { %1307 = vmatprep.subr.bf16.mxu1 %v2225_v22 }
 0x2e3   : > { %v1069_v25 = vsub.f32 %v1045_v6, %v1068_v24  ;;  %v1070_v26 = vsub.f32 %v1046_v0, %v1068_v24  ;;  %v1071_v27 = vsub.f32 %v1047_v3, %v1068_v24  ;;  %v1072_v28 = vsub.f32 %v1048_v7, %v1068_v24  ;;  %1308 = vmatpush1.bf16.msra.mxu1 %v2223_v21 }
 0x2e4   : > { %v1073_v29 = vsub.f32 %v1049_v1, %v1068_v24  ;;  %v1074_v33 = vsub.f32 %v1050_v2, %v1068_v24  ;;  %v1075_v35 = vsub.f32 %v1051_v8, %v1068_v24  ;;  %v1076_v37 = vsub.f32 %v1052_v14, %v1068_v24  ;;  %v2226_v24 = vld [vmem:[%s2945_s8 + $0x20] ss:$8 sps:$4 sm:$0xff]  }
 0x2e5   : > { %v1077_v30 = vmul.f32 1.442695, %v1069_v25  ;;  %v1079_v31 = vmul.f32 1.442695, %v1070_v26  ;;  %v1081_v32 = vmul.f32 1.442695, %v1071_v27 }
 0x2e6   : > { %v1083_v34 = vmul.f32 1.442695, %v1072_v28  ;;  %v1085_v36 = vmul.f32 1.442695, %v1073_v29  ;;  %v1087_v39 = vmul.f32 1.442695, %v1074_v33 }
 0x2e7   : > { %2259 = vpow2.f32 %v1077_v30  ;;  %v1089_v40 = vmul.f32 1.442695, %v1075_v35  ;;  %v1091_v41 = vmul.f32 1.442695, %v1076_v37  ;;  %v2228_v25 = vld [vmem:[%s2945_s8 + $0x24] ss:$8 sps:$4 sm:$0xff]   ;;  %v1348_v30 = vlaneseq }
 0x2e8   : > { %2261 = vpow2.f32 %v1079_v31  ;;  %1309 = vmatprep.subr.bf16.mxu1 %v2228_v25  ;;  %v2229_v26 = vld [vmem:[%s2611_s28 + $0x8] sm:$0xff]   ;;  %v2230_v27 = vld [vmem:[%s2945_s8 + $0x30] ss:$8 sps:$4 sm:$0xff]   ;;  %v2232_v28 = vld [vmem:[%s2945_s8 + $0x34] ss:$8 sps:$4 sm:$0xff]  }
 0x2e9   : > { %2263 = vpow2.f32 %v1081_v32  ;;  %1310 = vmatpush1.bf16.msra.mxu1 %v2226_v24  ;;  %2038 = vmatmul.mubr.msk.bf16.gmra.mrb[12].mxu0 %vm1403_vm12, %v2229_v26  ;;  %v2233_v29 = vld [vmem:[%s2611_s28 + $0x10] sm:$0xff]   ;;  %v1349_v31 = vshrl.u32 %v1348_v30, 7  ;;  %v1346_v32 = vld [vmem:[%s2948_s11] sm:$0x3] }
 0x2ea   : > { %2265 = vpow2.f32 %v1083_v34  ;;  %1311 = vmatprep.subr.bf16.mxu1 %v2232_v28  ;;  %1468 = vmatprep.mubr.bf16.mxu0 %v2407_v38 }
 0x2eb   : > { %2267 = vpow2.f32 %v1085_v36  ;;  %v1350_v33 = vsub.s32 0, %v1349_v31  ;;  %v1354_v34 = vsub.s32 1, %v1349_v31 }
 0x2ec   : > { %2269 = vpow2.f32 %v1087_v39 }
 0x2ed   : > { %2271 = vpow2.f32 %v1089_v40  ;;  %1312 = vmatpush1.bf16.msra.mxu1 %v2230_v27  ;;  %v1351_v35 = vrot.slane %v1346_v32, %v1350_v33  ;;  %v1355_v36 = vrot.slane %v1346_v32, %v1354_v34  ;;  %v1118_v40 = vunpack.c.h.bf16 %v2616_v48 }
 0x2ee   : > { %2273 = vpow2.f32 %v1091_v41  ;;  %2143 = vmatprep.subr.bf16.mxu1 %v2218_v16  ;;  %v1117_v41 = vunpack.c.l.bf16 %v2616_v48 }
 0x2f1   : > { %v2260_v42 = vpop.eup %2259  ;;  %2039 = vmatmul.mubr.msk.bf16.gmra.mrb[16].mxu0 %vm1403_vm12, %v2233_v29 }
 0x2f2   : > { %v2262_v43 = vpop.eup %2261  ;;  %v1093_v44 = vsel %vm1053_vm7, %v2260_v42, 0.0 }
 0x2f3   : > { %v2264_v45 = vpop.eup %2263  ;;  %v1094_v46 = vsel %vm1053_vm7, %v2262_v43, 0.0 }
 0x2f4   : > { %v2266_v47 = vpop.eup %2265  ;;  %v1095_v50 = vadd.f32 %v1094_v46, %v1093_v44  ;;  %v1096_v51 = vsel %vm1053_vm7, %v2264_v45, 0.0 }
 0x2f5   : > { %v2268_v52 = vpop.eup %2267  ;;  %v1098_v57 = vsel %vm1053_vm7, %v2266_v47, 0.0 }
 0x2f6   : > { %v1097_v53 = vadd.f32 %v1096_v51, %v1095_v50  ;;  %v2270_v59 = vpop.eup %2269  ;;  %v1100_v62 = vsel %vm1053_vm7, %v2268_v52, 0.0  ;;  %v1121_v51 = vunpack.c.l.bf16 %v2638_v55 }
 0x2f7   : > { %v2272_v63 = vpop.eup %2271  ;;  %v1102_v1 = vsel %vm1053_vm7, %v2270_v59, 0.0 }
 0x2f8   : > { %v1099_v61 = vadd.f32 %v1098_v57, %v1097_v53  ;;  %v2274_v2 = vpop.eup %2273  ;;  %v1104_v4 = vsel %vm1053_vm7, %v2272_v63, 0.0 }
 0x2f9   : > { %v1106_v6 = vsel %vm1053_vm7, %v2274_v2, 0.0 }
 0x2fa   : > { %v1101_v0 = vadd.f32 %v1100_v62, %v1099_v61  ;;  %v1122_v61 = vunpack.c.h.bf16 %v2638_v55  ;;  %v1124_v55 = vunpack.c.h.bf16 %v2644_v56 }
 0x2fc   : > { %v1103_v3 = vadd.f32 %v1102_v1, %v1101_v0 }
 0x2fe   : > { %v1105_v5 = vadd.f32 %v1104_v4, %v1103_v3 }
 0x300   : > { %v1107_v7 = vadd.f32 %v1106_v6, %v1105_v5 }
 0x302   : > { %2275 = vrcp.f32 %v1107_v7 }
 0x30c   : > { %v2276_v8 = vpop.eup %2275 }
 0x30d   : > { %v1110_v9 = vmul.f32 %v2276_v8, %v2262_v43  ;;  %v1109_v10 = vmul.f32 %v2276_v8, %v2260_v42  ;;  %v1111_v11 = vmul.f32 %v2276_v8, %v2264_v45  ;;  %v1112_v12 = vmul.f32 %v2276_v8, %v2266_v47 }
 0x30e   : > { %v1113_v13 = vmul.f32 %v2276_v8, %v2268_v52  ;;  %v1114_v14 = vmul.f32 %v2276_v8, %v2270_v59  ;;  %v1115_v19 = vmul.f32 %v2276_v8, %v2272_v63  ;;  %v1116_v23 = vmul.f32 %v2276_v8, %v2274_v2 }
 0x30f   : > { %1132 = vperm.xlu1 %2191, %v1110_v9   ;;  %1127 = vperm.xlu0 %2190, %v1109_v10   ;;  %v1119_v43 = vunpack.c.l.bf16 %v2636_v54  ;;  %v1120_v47 = vunpack.c.h.bf16 %v2636_v54  ;;  %v1123_v54 = vunpack.c.l.bf16 %v2644_v56 }
 0x313   : > { %1137 = vperm.xlu1 %2191, %v1111_v11   ;;  %1358 = vrot.lane.b32.xlu0 %v1355_v36, %s2408_s3 }
 0x317   : > { %1142 = vperm.xlu1 %2191, %v1112_v12  }
 0x31b   : > { %1147 = vperm.xlu1 %2191, %v1113_v13  }
 0x31f   : > { %1152 = vperm.xlu1 %2191, %v1114_v14  }
 0x323   : > { %1157 = vperm.xlu1 %2191, %v1115_v19   ;;  %v2234_v19 = vld [vmem:[%s2611_s28 + $0x18] sm:$0xff]   ;;  %s2409_s28 = smov 32  }
 0x327   : > { %1162 = vperm.xlu1 %2191, %v1116_v23  }
 0x32b   : > { %1356 = vrot.lane.b32.xlu1 %v1351_v35, %s2408_s3 }
 0x38e   : > { %v1133_v37 = vpop.permute.xlu1 %1132  ;;  %v1128_v42 = vpop.permute.xlu0 %1127 }
 0x38f   : > { %v1166_v45 = vmul.f32 %v1133_v37, %v1118_v40  ;;  %v1165_v46 = vmul.f32 %v1128_v42, %v1117_v41 }
 0x391   : > { %v1174_v53 = vsel %vm904_vm2, %v1166_v45, 0.0  ;;  %v1173_v57 = vsel %vm904_vm2, %v1165_v46, 0.0 }
 0x392   : > { %v1138_v39 = vpop.permute.xlu1 %1137  ;;  %v1175_v63 = vadd.f32 %v1174_v53, %v1173_v57  ;;  %v1359_v30 = vpop.permute.xlu0 %1358 }
 0x393   : > { %v1167_v50 = vmul.f32 %v1138_v39, %v1119_v43 }
 0x395   : > { %v1176_v48 = vsel %vm904_vm2, %v1167_v50, 0.0 }
 0x396   : > { %v1143_v44 = vpop.permute.xlu1 %1142  ;;  %v1177_v3 = vadd.f32 %v1176_v48, %v1175_v63 }
 0x397   : > { %v1168_v59 = vmul.f32 %v1143_v44, %v1120_v47 }
 0x399   : > { %v1178_v1 = vsel %vm904_vm2, %v1168_v59, 0.0 }
 0x39a   : > { %v1148_v52 = vpop.permute.xlu1 %1147  ;;  %v1179_v5 = vadd.f32 %v1178_v1, %v1177_v3 }
 0x39b   : > { %v1169_v62 = vmul.f32 %v1148_v52, %v1121_v51 }
 0x39d   : > { %v1180_v4 = vsel %vm904_vm2, %v1169_v62, 0.0 }
 0x39e   : > { %v1153_v0 = vpop.permute.xlu1 %1152  ;;  %v1181_v9 = vadd.f32 %v1180_v4, %v1179_v5 }
 0x39f   : > { %v1170_v2 = vmul.f32 %v1153_v0, %v1122_v61 }
 0x3a1   : > { %v1182_v7 = vsel %vm904_vm2, %v1170_v2, 0.0 }
 0x3a2   : > { %v1158_v6 = vpop.permute.xlu1 %1157  ;;  %v1183_v11 = vadd.f32 %v1182_v7, %v1181_v9 }
 0x3a3   : > { %v1171_v8 = vmul.f32 %v1158_v6, %v1123_v54 }
 0x3a5   : > { %v1184_v10 = vsel %vm904_vm2, %v1171_v8, 0.0 }
 0x3a6   : > { %v1163_v12 = vpop.permute.xlu1 %1162  ;;  %v1185_v14 = vadd.f32 %v1184_v10, %v1183_v11 }
 0x3a7   : > { %v1172_v13 = vmul.f32 %v1163_v12, %v1124_v55 }
 0x3a9   : > { %v1186_v16 = vsel %vm904_vm2, %v1172_v13, 0.0 }
 0x3aa   : > { %v1187_v17 = vadd.f32 %v1186_v16, %v1185_v14  ;;  %v1357_v29 = vpop.permute.xlu1 %1356 }
 0x3ab   : > { %v1360_v32 = vsel %vm904_vm2, %v1357_v29, %v1359_v30 }
 0x3ac   : > { %v1200_v18 = vpack.c.bf16 %v1187_v17, %v1187_v17 }
 0x3ae   : > { %2030 = vmatmul.mubr.msk.bf16.vlgmr.msra.gmra.mrb[12].mxu1 %vm904_vm2, %v1200_v18 }
 0x3af   : > { %2144 = vmatpush1.bf16.msra.mxu1 %v2684_v15  ;;  %1478 = vmatprep.mubr.bf16.mxu1 %v2407_v38 }
 0x3b3   : > { %v1450_v56 = vpop.f32.mrb[8].mxu0 }
 0x3b4   : > { %v2748_v20 = vpop.f32.mrb[9].mxu0 }
 0x3b5   : > { %v1454_v21 = vpop.f32.mrb[10].mxu0 }
 0x3b6   : > { %2040 = vmatmul.mubr.msk.bf16.vlgmr.msra.gmra.mrb[16].mxu1 %vm1403_vm12, %v2234_v19  ;;  %v2750_v22 = vpop.f32.mrb[11].mxu0 }
 0x3bc   : > { %v1460_v23 = vpop.f32.mrb[12].mxu0 }
 0x3bd   : > { %v2752_v24 = vpop.f32.mrb[13].mxu0 }
 0x3be   : > { %v1464_v25 = vpop.f32.mrb[14].mxu0 }
 0x3bf   : > { %v2754_v26 = vpop.f32.mrb[15].mxu0 }
 0x3c4   : > { %v1470_v27 = vpop.f32.mrb[16].mxu0 }
 0x3c5   : > { %v2756_v28 = vpop.f32.mrb[17].mxu0 }
 0x3c6   : > { %v1474_v15 = vpop.f32.mrb[18].mxu0 }
 0x3c7   : > { %v2758_v38 = vpop.f32.mrb[19].mxu0 }
 0x481   : > { %v1339_v31 = vpop.f32.mrb[12].mxu1 }
 0x482   : > { %v1340_v33 = vadd.f32 %v1339_v31, %v2649_v58  ;;  %v1341_v34 = vpop.f32.mrb[13].mxu1 }
 0x483   : > { %v2763_v35 = vadd.f32 %v1341_v34, %v2651_v60  ;;  %v1343_v36 = vpop.f32.mrb[14].mxu1 }
 0x484   : > { %v1362_v37 = vadd.f32 %v1360_v32, %v1340_v33  ;;  %v1344_v39 = vpop.f32.mrb[15].mxu1 }
 0x486   : > { %v1493_v40 = vadd.f32 %v1470_v27, %v1362_v37  ;;  %v1494_v41 = vadd.f32 %v1474_v15, %v1362_v37  ;;  %v1489_v42 = vadd.f32 %v1450_v56, %v1362_v37  ;;  %v1490_v43 = vadd.f32 %v1454_v21, %v1362_v37 }
 0x487   : > { %v1491_v44 = vadd.f32 %v1460_v23, %v1362_v37  ;;  %v1492_v45 = vadd.f32 %v1464_v25, %v1362_v37 }
 0x488   : > { %2277 = vtanh.f32 %v1489_v42  ;;  %v2041_v0 = vmul.f32 -1.442695, %v1489_v42  ;;  %v2042_v1 = vmul.f32 -1.442695, %v1490_v43  ;;  %v2045_v3 = vmul.f32 -1.442695, %v1493_v40 }
 0x489   : > { %v1480_v46 = vpop.f32.mrb[16].mxu1  ;;  %2279 = vtanh.f32 %v1490_v43  ;;  %v2043_v2 = vmul.f32 -1.442695, %v1491_v44  ;;  %v2044_v54 = vmul.f32 -1.442695, %v1492_v45 }
 0x48a   : > { %v1495_v47 = vadd.f32 %v1480_v46, %v1362_v37  ;;  %v2765_v50 = vpop.f32.mrb[17].mxu1  ;;  %2281 = vtanh.f32 %v1491_v44  ;;  %v2046_v4 = vmul.f32 -1.442695, %v1494_v41 }
 0x48b   : > { %v1484_v51 = vpop.f32.mrb[18].mxu1  ;;  %2283 = vtanh.f32 %v1492_v45 }
 0x48c   : > { %v1496_v52 = vadd.f32 %v1484_v51, %v1362_v37  ;;  %v2767_v58 = vpop.f32.mrb[19].mxu1  ;;  %2285 = vtanh.f32 %v1493_v40  ;;  %v2047_v5 = vmul.f32 -1.442695, %v1495_v47 }
 0x48d   : > { %2287 = vtanh.f32 %v1494_v41 }
 0x48e   : > { %2289 = vtanh.f32 %v1495_v47  ;;  %v2048_v7 = vmul.f32 -1.442695, %v1496_v52 }
 0x48f   : > { %2291 = vtanh.f32 %v1496_v52 }
 0x490   : > { %2293 = vpow2.f32 %v2041_v0 }
 0x491   : > { %2295 = vpow2.f32 %v2042_v1 }
 0x492   : > { %v2278_v60 = vpop.eup %2277  ;;  %2297 = vpow2.f32 %v2043_v2 }
 0x493   : > { %1569 = vrot.lane.b32.xlu1 %v2278_v60, %s2408_s3  ;;  %v2280_v53 = vpop.eup %2279  ;;  %2299 = vpow2.f32 %v2044_v54 }
 0x494   : > { %v2282_v57 = vpop.eup %2281  ;;  %1571 = vrot.lane.b32.xlu0 %v2280_v53, %s2408_s3  ;;  %2301 = vpow2.f32 %v2045_v3 }
 0x495   : > { %v2284_v59 = vpop.eup %2283  ;;  %2303 = vpow2.f32 %v2046_v4 }
 0x496   : > { %v2286_v61 = vpop.eup %2285  ;;  %2305 = vpow2.f32 %v2047_v5 }
 0x497   : > { %1573 = vrot.lane.b32.xlu1 %v2282_v57, %s2408_s3  ;;  %v2288_v48 = vpop.eup %2287  ;;  %2307 = vpow2.f32 %v2048_v7 }
 0x498   : > { %1575 = vrot.lane.b32.xlu0 %v2284_v59, %s2408_s3  ;;  %v2290_v62 = vpop.eup %2289 }
 0x499   : > { %v2292_v63 = vpop.eup %2291 }
 0x49a   : > { %v2294_v6 = vpop.eup %2293 }
 0x49b   : > { %1577 = vrot.lane.b32.xlu1 %v2286_v61, %s2408_s3  ;;  %v1521_v8 = vadd.f32 1.0, %v2294_v6  ;;  %v2296_v55 = vpop.eup %2295 }
 0x49c   : > { %1579 = vrot.lane.b32.xlu0 %v2288_v48, %s2408_s3  ;;  %v2298_v9 = vpop.eup %2297  ;;  %v1522_v10 = vadd.f32 1.0, %v2296_v55 }
 0x49d   : > { %2309 = vrcp.f32 %v1521_v8  ;;  %v2300_v11 = vpop.eup %2299  ;;  %v1523_v12 = vadd.f32 1.0, %v2298_v9 }
 0x49e   : > { %v2302_v13 = vpop.eup %2301  ;;  %2311 = vrcp.f32 %v1522_v10  ;;  %v1524_v14 = vadd.f32 1.0, %v2300_v11 }
 0x49f   : > { %1581 = vrot.lane.b32.xlu1 %v2290_v62, %s2408_s3  ;;  %v2304_v16 = vpop.eup %2303  ;;  %v1525_v17 = vadd.f32 1.0, %v2302_v13  ;;  %2313 = vrcp.f32 %v1523_v12 }
 0x4a0   : > { %1583 = vrot.lane.b32.xlu0 %v2292_v63, %s2408_s3  ;;  %v2306_v18 = vpop.eup %2305  ;;  %v1526_v19 = vadd.f32 1.0, %v2304_v16  ;;  %2315 = vrcp.f32 %v1524_v14 }
 0x4a1   : > { %v2308_v56 = vpop.eup %2307  ;;  %2317 = vrcp.f32 %v1525_v17  ;;  %v1527_v21 = vadd.f32 1.0, %v2306_v18 }
 0x4a2   : > { %2319 = vrcp.f32 %v1526_v19  ;;  %v1528_v15 = vadd.f32 1.0, %v2308_v56 }
 0x4a3   : > { %2321 = vrcp.f32 %v1527_v21  ;;  %v2235_v21 = vld [vmem:[%s2947_s10] sm:$0xff]  }
 0x4a4   : > { %2323 = vrcp.f32 %v1528_v15  ;;  %2131 = vmatprep.subr.bf16.mxu1 %v2235_v21 }
 0x4a5   : > { %2132 = vmatpush3.bf16.msra.mxu1 %v2235_v21 }
 0x4a7   : > { %v2777_v23 = vpop.eup %2309 }
 0x4a8   : > { %v2781_v29 = vpop.eup %2311  ;;  %v1553_v57 = vmul.f32 %v2777_v23, %v2618_v49 }
 0x4a9   : > { %v2783_v31 = vpop.eup %2313  ;;  %v1554_v48 = vmul.f32 %v2781_v29, %v2618_v49 }
 0x4aa   : > { %v2788_v36 = vpop.eup %2315  ;;  %v1555_v63 = vmul.f32 %v2783_v31, %v2618_v49 }
 0x4ab   : > { %v2791_v39 = vpop.eup %2317  ;;  %v1556_v54 = vmul.f32 %v2788_v36, %v2618_v49 }
 0x4ac   : > { %v2796_v43 = vpop.eup %2319  ;;  %v1557_v4 = vmul.f32 %v2791_v39, %v2618_v49 }
 0x4ad   : > { %v2799_v45 = vpop.eup %2321  ;;  %v1558_v8 = vmul.f32 %v2796_v43, %v2618_v49 }
 0x4ae   : > { %v2804_v52 = vpop.eup %2323  ;;  %v1559_v9 = vmul.f32 %v2799_v45, %v2618_v49 }
 0x4af   : > { %v1560_v14 = vmul.f32 %v2804_v52, %v2618_v49 }
 0x505   : > { %v1570_v25 = vpop.permute.xlu1 %1569 }
 0x506   : > { %v1593_v27 = vmul.f32 %v2777_v23, %v1570_v25  ;;  %v1572_v30 = vpop.permute.xlu0 %1571  ;;  %v2236_v25 = vld [vmem:[%s2947_s10 + $0x8] sm:$0xff]  }
 0x507   : > { %v1594_v32 = vmul.f32 %v2781_v29, %v1572_v30  ;;  %2133 = vmatprep.subr.bf16.mxu1 %v2236_v25 }
 0x508   : > { %1609 = vrot.lane.b32.xlu1 %v1593_v27, %s2409_s28  ;;  %2134 = vmatpush3.bf16.msra.mxu1 %v2236_v25 }
 0x509   : > { %v1574_v33 = vpop.permute.xlu1 %1573  ;;  %1611 = vrot.lane.b32.xlu0 %v1594_v32, %s2409_s28 }
 0x50a   : > { %v1595_v34 = vmul.f32 %v2783_v31, %v1574_v33  ;;  %v1576_v37 = vpop.permute.xlu0 %1575 }
 0x50b   : > { %v1596_v40 = vmul.f32 %v2788_v36, %v1576_v37 }
 0x50c   : > { %1613 = vrot.lane.b32.xlu1 %v1595_v34, %s2409_s28 }
 0x50d   : > { %v1578_v41 = vpop.permute.xlu1 %1577  ;;  %1615 = vrot.lane.b32.xlu0 %v1596_v40, %s2409_s28 }
 0x50e   : > { %v1597_v42 = vmul.f32 %v2791_v39, %v1578_v41  ;;  %v1580_v44 = vpop.permute.xlu0 %1579 }
 0x50f   : > { %v1598_v46 = vmul.f32 %v2796_v43, %v1580_v44 }
 0x510   : > { %1617 = vrot.lane.b32.xlu1 %v1597_v42, %s2409_s28 }
 0x511   : > { %v1582_v47 = vpop.permute.xlu1 %1581  ;;  %1619 = vrot.lane.b32.xlu0 %v1598_v46, %s2409_s28 }
 0x512   : > { %v1599_v51 = vmul.f32 %v2799_v45, %v1582_v47  ;;  %v1584_v60 = vpop.permute.xlu0 %1583 }
 0x513   : > { %v1600_v53 = vmul.f32 %v2804_v52, %v1584_v60 }
 0x514   : > { %1621 = vrot.lane.b32.xlu1 %v1599_v51, %s2409_s28 }
 0x515   : > { %1623 = vrot.lane.b32.xlu0 %v1600_v53, %s2409_s28 }
 0x57a   : > { %v1610_v59 = vpop.permute.xlu1 %1609 }
 0x57b   : > { %v1633_v61 = vadd.f32 %v1610_v59, %v1553_v57  ;;  %v1612_v62 = vpop.permute.xlu0 %1611 }
 0x57c   : > { %v1634_v0 = vadd.f32 %v1612_v62, %v1554_v48 }
 0x57d   : > { %2325 = vtanh.f32 %v1633_v61 }
 0x57e   : > { %v1614_v1 = vpop.permute.xlu1 %1613  ;;  %2327 = vtanh.f32 %v1634_v0 }
 0x57f   : > { %v1635_v2 = vadd.f32 %v1614_v1, %v1555_v63  ;;  %v1616_v3 = vpop.permute.xlu0 %1615 }
 0x580   : > { %v1636_v5 = vadd.f32 %v1616_v3, %v1556_v54 }
 0x581   : > { %2329 = vtanh.f32 %v1635_v2 }
 0x582   : > { %v1618_v6 = vpop.permute.xlu1 %1617  ;;  %2331 = vtanh.f32 %v1636_v5 }
 0x583   : > { %v1637_v7 = vadd.f32 %v1618_v6, %v1557_v4  ;;  %v1620_v55 = vpop.permute.xlu0 %1619 }
 0x584   : > { %v1638_v11 = vadd.f32 %v1620_v55, %v1558_v8 }
 0x585   : > { %2333 = vtanh.f32 %v1637_v7 }
 0x586   : > { %v1622_v12 = vpop.permute.xlu1 %1621  ;;  %2335 = vtanh.f32 %v1638_v11 }
 0x587   : > { %v2326_v10 = vpop.eup %2325  ;;  %v1639_v13 = vadd.f32 %v1622_v12, %v1559_v9  ;;  %v1624_v16 = vpop.permute.xlu0 %1623 }
 0x588   : > { %1657 = vrot.lane.b32.xlu1 %v2326_v10, %s2408_s3  ;;  %v2328_v17 = vpop.eup %2327  ;;  %v1640_v18 = vadd.f32 %v1624_v16, %v1560_v14 }
 0x589   : > { %2337 = vtanh.f32 %v1639_v13  ;;  %1659 = vrot.lane.b32.xlu0 %v2328_v17, %s2408_s3 }
 0x58a   : > { %2339 = vtanh.f32 %v1640_v18 }
 0x58b   : > { %v2330_v19 = vpop.eup %2329 }
 0x58c   : > { %1661 = vrot.lane.b32.xlu1 %v2330_v19, %s2408_s3  ;;  %v2332_v56 = vpop.eup %2331 }
 0x58d   : > { %1663 = vrot.lane.b32.xlu0 %v2332_v56, %s2408_s3 }
 0x58f   : > { %v2334_v49 = vpop.eup %2333 }
 0x590   : > { %1665 = vrot.lane.b32.xlu1 %v2334_v49, %s2408_s3  ;;  %v2336_v27 = vpop.eup %2335 }
 0x591   : > { %1667 = vrot.lane.b32.xlu0 %v2336_v27, %s2408_s3 }
 0x593   : > { %v2338_v15 = vpop.eup %2337 }
 0x594   : > { %1669 = vrot.lane.b32.xlu1 %v2338_v15, %s2408_s3  ;;  %v2340_v30 = vpop.eup %2339 }
 0x595   : > { %1671 = vrot.lane.b32.xlu0 %v2340_v30, %s2408_s3 }
 0x5fa   : > { %v1658_v32 = vpop.permute.xlu1 %1657 }
 0x5fb   : > { %v1681_v33 = vmul.f32 %v2777_v23, %v1658_v32  ;;  %v1660_v34 = vpop.permute.xlu0 %1659 }
 0x5fc   : > { %v1682_v37 = vmul.f32 %v2781_v29, %v1660_v34 }
 0x5fe   : > { %v1662_v40 = vpop.permute.xlu1 %1661  ;;  %v1689_v41 = vpack.c.bf16 %v1682_v37, %v1681_v33 }
 0x5ff   : > { %v1683_v42 = vmul.f32 %v2783_v31, %v1662_v40  ;;  %v1664_v44 = vpop.permute.xlu0 %1663 }
 0x600   : > { %v1684_v46 = vmul.f32 %v2788_v36, %v1664_v44  ;;  %1701 = vrot.lane.b32.xlu1 %v1689_v41, %s2409_s28 }
 0x602   : > { %v1666_v47 = vpop.permute.xlu1 %1665  ;;  %v1690_v51 = vpack.c.bf16 %v1684_v46, %v1683_v42 }
 0x603   : > { %v1685_v60 = vmul.f32 %v2791_v39, %v1666_v47  ;;  %v1668_v53 = vpop.permute.xlu0 %1667 }
 0x604   : > { %v1686_v57 = vmul.f32 %v2796_v43, %v1668_v53  ;;  %1703 = vrot.lane.b32.xlu0 %v1690_v51, %s2409_s28 }
 0x606   : > { %v1670_v23 = vpop.permute.xlu1 %1669  ;;  %v1691_v29 = vpack.c.bf16 %v1686_v57, %v1685_v60 }
 0x607   : > { %v1687_v59 = vmul.f32 %v2799_v45, %v1670_v23  ;;  %v1672_v31 = vpop.permute.xlu0 %1671 }
 0x608   : > { %v1688_v61 = vmul.f32 %v2804_v52, %v1672_v31  ;;  %1705 = vrot.lane.b32.xlu1 %v1691_v29, %s2409_s28 }
 0x60a   : > { %v1692_v36 = vpack.c.bf16 %v1688_v61, %v1687_v59 }
 0x60c   : > { %1707 = vrot.lane.b32.xlu0 %v1692_v36, %s2409_s28 }
 0x672   : > { %v1702_v48 = vpop.permute.xlu1 %1701 }
 0x673   : > { %2135 = vmatprep.mubr.msk.bf16.mxu1 %vm816_vm1, %v1702_v48 }
 0x676   : > { %v1704_v39 = vpop.permute.xlu0 %1703 }
 0x677   : > { %2136 = vmatmul.mubr.msk.bf16.vlgmr.msra.gmra.mrb[20].mxu1 %vm816_vm1, %v1704_v39 }
 0x67a   : > { %v1706_v43 = vpop.permute.xlu1 %1705 }
 0x67b   : > { %2139 = vmatprep.mubr.msk.bf16.mxu1 %vm816_vm1, %v1706_v43 }
 0x67e   : > { %v1708_v62 = vpop.permute.xlu0 %1707 }
 0x67f   : > { %2140 = vmatmul.mubr.msk.bf16.gmra.mrb[24].mxu1 %vm816_vm1, %v1708_v62 }
 0x74a   : > { %v2137_v45 = vpop.f32.mrb[20].mxu1 }
 0x74b   : > { %v1800_v52 = vadd.f32 %v2137_v45, %v2752_v24  ;;  %v1767_v63 = vpop.f32.mrb[21].mxu1 }
 0x74c   : > { %v1798_v0 = vadd.f32 %v1767_v63, %v2748_v20  ;;  %v2138_v1 = vpop.f32.mrb[22].mxu1 }
 0x74d   : > { %v1808_v2 = vadd.f32 %v1800_v52, %v2763_v35  ;;  %v1801_v54 = vadd.f32 %v2138_v1, %v2754_v26  ;;  %v1770_v3 = vpop.f32.mrb[23].mxu1 }
 0x74e   : > { %v1806_v4 = vadd.f32 %v1798_v0, %v2763_v35  ;;  %v1799_v5 = vadd.f32 %v1770_v3, %v2750_v22 }
 0x74f   : > { %v1809_v6 = vadd.f32 %v1801_v54, %v2763_v35  ;;  %1822 = vrot.lane.b32.xlu1 %v1808_v2, %s2408_s3 }
 0x750   : > { %1814 = vst.msk [vmem:[%s2864_s16] sm:$0xff] %vm816_vm1, %v1806_v4  ;;  %v1807_v20 = vadd.f32 %v1799_v5, %v2763_v35 }
 0x752   : > { %v2141_v24 = vpop.f32.mrb[24].mxu1 }
 0x753   : > { %v1804_v26 = vadd.f32 %v2141_v24, %v2765_v50  ;;  %1816 = vrot.lane.b32.xlu1 %v1807_v20, %s2409_s28  ;;  %v1783_v7 = vpop.f32.mrb[25].mxu1 }
 0x754   : > { %v1802_v22 = vadd.f32 %v1783_v7, %v2756_v28  ;;  %v2142_v8 = vpop.f32.mrb[26].mxu1 }
 0x755   : > { %v1812_v55 = vadd.f32 %v1804_v26, %v2763_v35  ;;  %v1805_v9 = vadd.f32 %v2142_v8, %v2767_v58  ;;  %v1786_v10 = vpop.f32.mrb[27].mxu1 }
 0x756   : > { %v1810_v11 = vadd.f32 %v1802_v22, %v2763_v35  ;;  %v1803_v12 = vadd.f32 %v1786_v10, %v2758_v38 }
 0x757   : > { %v1813_v13 = vadd.f32 %v1805_v9, %v2763_v35  ;;  %1828 = vrot.lane.b32.xlu1 %v1809_v6, %s2410_s17  ;;  %1840 = vrot.lane.b32.xlu0 %v1812_v55, %s2408_s3 }
 0x758   : > { %1833 = vst.msk [vmem:[%s2864_s16 + $0x8] sm:$0xff] %vm816_vm1, %v1810_v11  ;;  %v1811_v28 = vadd.f32 %v1803_v12, %v2763_v35 }
 0x75b   : > { %1835 = vrot.lane.b32.xlu0 %v1811_v28, %s2409_s28 }
 0x75f   : > { %1845 = vrot.lane.b32.xlu0 %v1813_v13, %s2410_s17 }
 0x7c1   : > { %v1823_v50 = vpop.permute.xlu1 %1822 }
 0x7c5   : > { %v1817_v38 = vpop.permute.xlu1 %1816 }
 0x7c6   : > { %1820 = vst.msk [vmem:[%s2864_s16] sm:$0xff] %vm1819_vm13, %v1817_v38 }
 0x7c7   : > { %1826 = vst.msk [vmem:[%s2864_s16] sm:$0xff] %vm1825_vm14, %v1823_v50 }
 0x7c9   : > { %v1829_v58 = vpop.permute.xlu1 %1828  ;;  %v1841_v14 = vpop.permute.xlu0 %1840 }
 0x7ca   : > { %1832 = vst.msk [vmem:[%s2864_s16] sm:$0xff] %vm1831_vm15, %v1829_v58 }
 0x7cd   : > { %v1836_v16 = vpop.permute.xlu0 %1835 }
 0x7ce   : > { %1838 = vst.msk [vmem:[%s2864_s16 + $0x8] sm:$0xff] %vm1819_vm13, %v1836_v16 }
 0x7cf   : > { %1843 = vst.msk [vmem:[%s2864_s16 + $0x8] sm:$0xff] %vm1825_vm14, %v1841_v14 }
 0x7d1   : > { %v1846_v35 = vpop.permute.xlu0 %1845 }
 0x7d2   : > { %1848 = vst.msk [vmem:[%s2864_s16 + $0x8] sm:$0xff] %vm1831_vm15, %v1846_v35 }
 0x7d3   : > { %2354 = shalt.err (!%p2351_p7)
}
 0x7d4   : > { %s2355_s13 = scalar_lea.hbm %s2892_s18, 256  ;;  %s2359_s1 = scalar_lea.hbm %s2949_s12, 512 }
 0x7d5   : > { %p2356_p10 = scmp.ne.s32.totalorder %s2892_s18, %s2355_s13  ;;  %p2360_p13 = scmp.lt.u32.totalorder %s2892_s18, %s2949_s12 }
 0x7d6   : > { %p2361_p0 = scmp.lt.u32.totalorder %s2359_s1, %s2355_s13  ;;  %p2363_p2 = scmp.lt.u32.totalorder %s2355_s13, %s2892_s18 }
 0x7d7   : > { %p2357_p11 = pnand %p2356_p10, %p2520_p6 }
 0x7d8   : > { %p2362_p1 = por %p2361_p0, %p2360_p13 }
 0x7d9   : > { %p2358_p12 = pneg %p2357_p11 }
 0x7da   : > { %p2364_p3 = por %p2363_p2, %p2362_p1 }
 0x7dc   : > { %p2365_p4 = pnand %p2364_p3, %p2358_p12 }
 0x7de   : > { %2368 = shalt.err (!%p2365_p4)
}
 0x7df   : > { %2145 = dma.vmem_to_hbm [thread:$0]  (%p2520_p6), %s2894_s29, 256, %s2892_s18, %s1850_s19  }
 0x7e0 PF: > { %s1876_s0 = sand.u32 1, %s2391_s21   ;;  %p2148_p5 = pnand %p1979_p9, %p2524_p8 }
 0x7e1   : > { %s1877_s25 = scalar_lea.sflag [#allocation6], %s1876_s0 }
 0x7e2   : > { %2386 = dma.done.wait (!%p2148_p5), %s1877_s25, 256  }
 0x7e3   : > { %2388 = vsyncadd (!%p2148_p5), %s1877_s25, 4294967040  ;;  %p22_p7 = scmp.ge.s32.totalorder %s2502_s27, 4   ;;  %s2959_s21 = smov %s2395_s22 }
 0x7e4   : > { %s2960_s22 = smov %s2399_s23  ;;  %s2961_s23 = smov %s2514_s30 }
 0x7e5   : > { %s2962_s24 = smov %s2502_s27  ;;  %24 = sbr.rel (!%p22_p7) target bundleno = 7 (0x7), region = 247 }
 0x7ec   :  { %1882 = vsyncpa [#allocation6], 1 }
 0x7ed   :  { %1884 = vsyncpa [#allocation6 + $0x1], 1 }

</bundles_post_ra>
